<compile_context>
chip_gen: v7x
topology: tpu7x:2x2x1
jax: 0.10.0
libtpu: 0.0.40
codegen_flags: <defaults>
</compile_context>

<pallas_src>
from functools import partial

import jax
import jax.numpy as jnp
from jax.experimental import pallas as pl
from jax.experimental.pallas import tpu as pltpu

BN_EPS = 1e-5


def _out_hw(h, w, kh, kw, stride, padding, dilation):
    ho = (h + 2 * padding - dilation * (kh - 1) - 1) // stride + 1
    wo = (w + 2 * padding - dilation * (kw - 1) - 1) // stride + 1
    return ho, wo


# -----------------------------------------------------------------------------
# Pass 1: fused im2col + conv matmul + per-image BN sum / sum-of-squares
# -----------------------------------------------------------------------------
def conv_stats_kernel(x_ref, w_ref, y_ref, stats_ref, *, kh, kw, dil, ho, wo):
    # x_ref:     (1, C, Hp, Wp)    padded image (or im2col patches when kh=kw=1)
    # w_ref:     (kh*kw, Cout, C)  per-tap weights, resident in VMEM
    # y_ref:     (1, Cout, Ho*Wo)  conv output, compute dtype, lane-dense hw axis
    # stats_ref: (1, Cout, 2)      per-image [sum, sumsq] in f32
    hw = ho * wo
    acc = None
    for t in range(kh * kw):
        i, j = t // kw, t % kw
        slab = x_ref[0, :, i * dil:i * dil + ho, j * dil:j * dil + wo]  # (C,Ho,Wo)
        slab = slab.reshape(slab.shape[0], hw)                          # (C, hw)
        part = jax.lax.dot_general(
            w_ref[t], slab,
            dimension_numbers=(((1,), (0,)), ((), ())),
            preferred_element_type=jnp.float32)                         # MXU, f32 acc
        acc = part if acc is None else acc + part
    y_ref[0] = acc.astype(y_ref.dtype)
    # Exact per-image statistics from the f32 accumulator (one cross-lane reduce per
    # image).  NOTE: var = E[y^2]-mean^2 downstream is single-pass in f32 and can
    # lose precision when |mean| >> std; acceptable for BN-normalised activations.
    s = jnp.sum(acc, axis=1, keepdims=True)
    ss = jnp.sum(acc * acc, axis=1, keepdims=True)
    stats_ref[0] = jnp.concatenate([s, ss], axis=1)


# -----------------------------------------------------------------------------
# Pass 2: y_hat = y * scale + shift  (mean/var/gamma/beta folded into scale/shift)
# -----------------------------------------------------------------------------
def bn_apply_kernel(y_ref, scale_ref, shift_ref, o_ref):
    y = y_ref[0].astype(jnp.float32)          # elementwise math in f32 (v5e-safe)
    o_ref[0] = (y * scale_ref[...] + shift_ref[...]).astype(o_ref.dtype)


# -----------------------------------------------------------------------------
# Host-side helpers
# -----------------------------------------------------------------------------
def _im2col(x, kh, kw, stride, padding, dilation, cd):
    """x (N,Cin,H,W) -> patches (N, Cin*kh*kw, Ho, Wo), matching OIHW weight flatten."""
    n, c, h, w = x.shape
    ho, wo = _out_hw(h, w, kh, kw, stride, padding, dilation)
    xp = jnp.pad(x, ((0, 0), (0, 0), (padding, padding), (padding, padding)))
    taps = []
    for i in range(kh):
        for j in range(kw):
            taps.append(
                xp[:, :,
                   i * dilation: i * dilation + stride * (ho - 1) + 1: stride,
                   j * dilation: j * dilation + stride * (wo - 1) + 1: stride])
    pat = jnp.stack(taps, axis=2).reshape(n, c * kh * kw, ho, wo)
    return pat.astype(cd)


def _vmem_limit_bytes(est):
    # Generation-aware scoped-VMEM cap: ~48 MiB on v7x (64 MiB physical),
    # up to 96 MiB on v5e/v6e (128 MiB physical).
    try:
        phys = int(pltpu.get_tpu_info().vmem_capacity_bytes)
    except Exception:
        phys = 64 << 20
    cap = (phys * 3) // 4
    return int(min(max(est + (8 << 20), 32 << 20), cap))


@partial(jax.jit,
         static_argnames=("stride", "padding", "dilation", "groups", "compute_dtype"))
def conv_bn_forward(x, weight, gamma, beta, *, stride=1, padding=0, dilation=1,
                    groups=1, compute_dtype=None):
    """ConvBN.forward (deploy=False, nonlinear=Identity). NCHW in / NCHW out."""
    assert groups == 1, "TODO(synk): grouped convolution (groups > 1) not implemented"
    cout, cin, kh, kw = weight.shape
    n, _, h, w = x.shape
    cd = jax.dtypes.canonicalize_dtype(
        compute_dtype if compute_dtype is not None else x.dtype)
    ho, wo = _out_hw(h, w, kh, kw, stride, padding, dilation)
    hw = ho * wo

    if stride == 1:
        # Fused-im2col fast path: kernel reads the padded image directly (x read once).
        x_k = jnp.pad(x, ((0, 0), (0, 0), (padding, padding),
                          (padding, padding))).astype(cd)
        w_k = jnp.transpose(weight, (2, 3, 0, 1)).reshape(kh * kw, cout, cin).astype(cd)
        taps, c_eff = kh * kw, cin
        k_kh, k_kw, k_dil = kh, kw, dilation
    else:
        # General path: host-side im2col, then the same kernel as a 1x1 "conv".
        x_k = _im2col(x, kh, kw, stride, padding, dilation, cd)
        w_k = weight.reshape(1, cout, cin * kh * kw).astype(cd)
        taps, c_eff = 1, cin * kh * kw
        k_kh, k_kw, k_dil = 1, 1, 1

    _, _, hp, wp = x_k.shape
    isz = jnp.dtype(cd).itemsize
    y_dtype = cd if isz < 4 else jnp.float32      # bf16 inter-pass y on bf16 paths

    # Explicit multi-buffer VMEM budget (double-buffered blocks + temporaries).
    est = (2 * c_eff * hp * max(wp, 128) * isz              # x image blocks (lane pad)
           + 2 * taps * cout * c_eff * isz                  # weight copies
           + 2 * cout * hw * jnp.dtype(y_dtype).itemsize    # y output blocks
           + cout * hw * 4 + c_eff * hw * isz               # in-kernel acc + one slab
           + 2 * cout * 128 * 4)                            # stats blocks (lane pad)
    limit = _vmem_limit_bytes(est)

    kernel = partial(conv_stats_kernel, kh=k_kh, kw=k_kw, dil=k_dil, ho=ho, wo=wo)
    y_full, partials = pl.pallas_call(
        kernel,
        out_shape=(jax.ShapeDtypeStruct((n, cout, hw), y_dtype),
                   jax.ShapeDtypeStruct((n, cout, 2), jnp.float32)),
        grid=(n,),
        in_specs=[
            pl.BlockSpec((1, c_eff, hp, wp), lambda b: (b, 0, 0, 0)),
            pl.BlockSpec((taps, cout, c_eff), lambda b: (0, 0, 0)),   # resident W
        ],
        out_specs=(pl.BlockSpec((1, cout, hw), lambda b: (b, 0, 0)),
                   pl.BlockSpec((1, cout, 2), lambda b: (b, 0, 0))),
        compiler_params=pltpu.CompilerParams(
            dimension_semantics=("parallel",), vmem_limit_bytes=limit),
    )(x_k, w_k)

    # Tiny f32 epilogue: global batch stats -> per-channel (scale, shift).
    m = float(n * hw)
    sums = jnp.sum(partials, axis=0)                         # (Cout, 2)
    mean = sums[:, 0] / m
    var = jnp.maximum(sums[:, 1] / m - mean * mean, 0.0)     # biased var (training BN)
    inv_std = jax.lax.rsqrt(var + BN_EPS)
    scale = gamma.astype(jnp.float32) * inv_std
    shift = beta.astype(jnp.float32) - mean * scale

    out_dtype = x.dtype
    alias = {0: 0} if jnp.dtype(y_dtype) == jnp.dtype(out_dtype) else {}
    out_flat = pl.pallas_call(
        bn_apply_kernel,
        out_shape=jax.ShapeDtypeStruct((n, cout, hw), out_dtype),
        grid=(n,),
        in_specs=[
            pl.BlockSpec((1, cout, hw), lambda b: (b, 0, 0)),
            pl.BlockSpec((cout, 1), lambda b: (0, 0)),
            pl.BlockSpec((cout, 1), lambda b: (0, 0)),
        ],
        out_specs=pl.BlockSpec((1, cout, hw), lambda b: (b, 0, 0)),
        input_output_aliases=alias,                          # in-place over y_full
        compiler_params=pltpu.CompilerParams(
            dimension_semantics=("parallel",), vmem_limit_bytes=limit),
    )(y_full, scale.reshape(cout, 1), shift.reshape(cout, 1))

    # (N, Cout, Ho*Wo) -> NCHW: reshape only, no transpose / extra HBM pass.
    return out_flat.reshape(n, cout, ho, wo)


def _reference(x, weight, gamma, beta, *, stride, padding, dilation=1):
    """Pure-JAX reference: conv2d (no bias) + training-mode BatchNorm2d."""
    y = jax.lax.conv_general_dilated(
        x, weight,
        window_strides=(stride, stride),
        padding=[(padding, padding), (padding, padding)],
        rhs_dilation=(dilation, dilation),
        dimension_numbers=("NCHW", "OIHW", "NCHW"),
        precision=jax.lax.Precision.HIGHEST)
    mean = jnp.mean(y, axis=(0, 2, 3), keepdims=True)
    var = jnp.mean((y - mean) ** 2, axis=(0, 2, 3), keepdims=True)
    y_hat = (y - mean) * jax.lax.rsqrt(var + BN_EPS)
    return y_hat * gamma.reshape(1, -1, 1, 1) + beta.reshape(1, -1, 1, 1)


if __name__ == "__main__":
    # Module config: ConvBN(in_channels=4, out_channels=8, kernel_size=3, padding=1)
    N, Cin, H, W = 2, 4, 16, 16
    Cout, KH, KW = 8, 3, 3

    key = jax.random.PRNGKey(0)
    kx, kw_ = jax.random.split(key)
    x = jax.random.normal(kx, (N, Cin, H, W), dtype=jnp.float32)
    fan_in = Cin * KH * KW
    bound = 1.0 / (fan_in ** 0.5)
    weight = jax.random.uniform(kw_, (Cout, Cin, KH, KW), dtype=jnp.float32,
                                minval=-bound, maxval=bound)
    gamma = jnp.ones((Cout,), dtype=jnp.float32)
    beta = jnp.zeros((Cout,), dtype=jnp.float32)

    # f32, stride=1/pad=1: fused-im2col path, checked against the reference.
    out = jax.block_until_ready(
        conv_bn_forward(x, weight, gamma, beta, stride=1, padding=1))
    ref = _reference(x, weight, gamma, beta, stride=1, padding=1)
    assert out.shape == (N, Cout, H, W), out.shape
    assert jnp.allclose(out, ref, rtol=1e-3, atol=1e-3), \
        float(jnp.max(jnp.abs(out - ref)))

    # stride=2: host-im2col fallback feeding the same kernel.
    out_s2 = jax.block_until_ready(
        conv_bn_forward(x, weight, gamma, beta, stride=2, padding=1))
    ref_s2 = _reference(x, weight, gamma, beta, stride=2, padding=1)
    assert out_s2.shape == ref_s2.shape, out_s2.shape
    assert jnp.allclose(out_s2, ref_s2, rtol=1e-3, atol=1e-3), \
        float(jnp.max(jnp.abs(out_s2 - ref_s2)))

    # bf16 MXU path (bf16 matmul inputs + bf16 inter-pass y): loose sanity check.
    out_bf16 = jax.block_until_ready(
        conv_bn_forward(x, weight, gamma, beta, stride=1, padding=1,
                        compute_dtype=jnp.bfloat16))
    assert out_bf16.shape == (N, Cout, H, W)
    assert bool(jnp.all(jnp.isfinite(out_bf16)))
    assert float(jnp.max(jnp.abs(out_bf16.astype(jnp.float32) - ref))) < 0.1

    print("KERNEL_OK")
</pallas_src>

<mosaic_0001>
module attributes {stable_mosaic.version = 11 : i64} {
  func.func @conv_stats_kernel(%arg0: i32, %arg1: memref<1x4x18x18xf32, #tpu.memory_space<vmem>>, %arg2: memref<9x8x4xf32, #tpu.memory_space<vmem>>, %arg3: memref<1x8x256xf32, #tpu.memory_space<vmem>>, %arg4: memref<1x8x2xf32, #tpu.memory_space<vmem>>) attributes {dimension_semantics = [#tpu.dimension_semantics<parallel>], iteration_bounds = array<i64: 2>, scalar_prefetch = 0 : i64, scratch_operands = 0 : i64, tpu.core_type = #tpu.core_type<tc>, window_params = [{transform_indices = @transform_0, window_bounds = array<i64: 1, 4, 18, 18>}, {pipeline_mode = #tpu.pipeline_mode<synchronous>, transform_indices = @transform_1, window_bounds = array<i64: 9, 8, 4>}, {transform_indices = @transform_2, window_bounds = array<i64: 1, 8, 256>}, {transform_indices = @transform_3, window_bounds = array<i64: 1, 8, 2>}]} {
    %c0 = arith.constant 0 : index
    %c0_0 = arith.constant 0 : index
    %c0_1 = arith.constant 0 : index
    %c0_2 = arith.constant 0 : index
    %0 = vector.load %arg1[%c0, %c0_0, %c0_1, %c0_2] : memref<1x4x18x18xf32, #tpu.memory_space<vmem>>, vector<1x4x16x16xf32>
    %1 = vector.shape_cast %0 : vector<1x4x16x16xf32> to vector<4x16x16xf32>
    %2 = vector.shape_cast %1 : vector<4x16x16xf32> to vector<4x256xf32>
    %c0_3 = arith.constant 0 : index
    %c0_4 = arith.constant 0 : index
    %c0_5 = arith.constant 0 : index
    %3 = vector.load %arg2[%c0_3, %c0_4, %c0_5] : memref<9x8x4xf32, #tpu.memory_space<vmem>>, vector<1x8x4xf32>
    %4 = vector.shape_cast %3 : vector<1x8x4xf32> to vector<8x4xf32>
    %cst = arith.constant dense<0.000000e+00> : vector<8x256xf32>
    %5 = tpu.matmul %4, %2, %cst {dimension_numbers = #tpu.dot_dimension_numbers<[1], [0], [0], [1], [0, 0, 1, 1], [], []>} : vector<8x4xf32>, vector<4x256xf32>, vector<8x256xf32> -> vector<8x256xf32>
    %c0_6 = arith.constant 0 : index
    %c0_7 = arith.constant 0 : index
    %c0_8 = arith.constant 0 : index
    %c1 = arith.constant 1 : index
    %6 = vector.load %arg1[%c0_6, %c0_7, %c0_8, %c1] : memref<1x4x18x18xf32, #tpu.memory_space<vmem>>, vector<1x4x16x16xf32>
    %7 = vector.shape_cast %6 : vector<1x4x16x16xf32> to vector<4x16x16xf32>
    %8 = vector.shape_cast %7 : vector<4x16x16xf32> to vector<4x256xf32>
    %c1_9 = arith.constant 1 : index
    %c0_10 = arith.constant 0 : index
    %c0_11 = arith.constant 0 : index
    %9 = vector.load %arg2[%c1_9, %c0_10, %c0_11] : memref<9x8x4xf32, #tpu.memory_space<vmem>>, vector<1x8x4xf32>
    %10 = vector.shape_cast %9 : vector<1x8x4xf32> to vector<8x4xf32>
    %cst_12 = arith.constant dense<0.000000e+00> : vector<8x256xf32>
    %11 = tpu.matmul %10, %8, %cst_12 {dimension_numbers = #tpu.dot_dimension_numbers<[1], [0], [0], [1], [0, 0, 1, 1], [], []>} : vector<8x4xf32>, vector<4x256xf32>, vector<8x256xf32> -> vector<8x256xf32>
    %12 = arith.addf %5, %11 : vector<8x256xf32>
    %c0_13 = arith.constant 0 : index
    %c0_14 = arith.constant 0 : index
    %c0_15 = arith.constant 0 : index
    %c2 = arith.constant 2 : index
    %13 = vector.load %arg1[%c0_13, %c0_14, %c0_15, %c2] : memref<1x4x18x18xf32, #tpu.memory_space<vmem>>, vector<1x4x16x16xf32>
    %14 = vector.shape_cast %13 : vector<1x4x16x16xf32> to vector<4x16x16xf32>
    %15 = vector.shape_cast %14 : vector<4x16x16xf32> to vector<4x256xf32>
    %c2_16 = arith.constant 2 : index
    %c0_17 = arith.constant 0 : index
    %c0_18 = arith.constant 0 : index
    %16 = vector.load %arg2[%c2_16, %c0_17, %c0_18] : memref<9x8x4xf32, #tpu.memory_space<vmem>>, vector<1x8x4xf32>
    %17 = vector.shape_cast %16 : vector<1x8x4xf32> to vector<8x4xf32>
    %cst_19 = arith.constant dense<0.000000e+00> : vector<8x256xf32>
    %18 = tpu.matmul %17, %15, %cst_19 {dimension_numbers = #tpu.dot_dimension_numbers<[1], [0], [0], [1], [0, 0, 1, 1], [], []>} : vector<8x4xf32>, vector<4x256xf32>, vector<8x256xf32> -> vector<8x256xf32>
    %19 = arith.addf %12, %18 : vector<8x256xf32>
    %c0_20 = arith.constant 0 : index
    %c0_21 = arith.constant 0 : index
    %c1_22 = arith.constant 1 : index
    %c0_23 = arith.constant 0 : index
    %20 = vector.load %arg1[%c0_20, %c0_21, %c1_22, %c0_23] : memref<1x4x18x18xf32, #tpu.memory_space<vmem>>, vector<1x4x16x16xf32>
    %21 = vector.shape_cast %20 : vector<1x4x16x16xf32> to vector<4x16x16xf32>
    %22 = vector.shape_cast %21 : vector<4x16x16xf32> to vector<4x256xf32>
    %c3 = arith.constant 3 : index
    %c0_24 = arith.constant 0 : index
    %c0_25 = arith.constant 0 : index
    %23 = vector.load %arg2[%c3, %c0_24, %c0_25] : memref<9x8x4xf32, #tpu.memory_space<vmem>>, vector<1x8x4xf32>
    %24 = vector.shape_cast %23 : vector<1x8x4xf32> to vector<8x4xf32>
    %cst_26 = arith.constant dense<0.000000e+00> : vector<8x256xf32>
    %25 = tpu.matmul %24, %22, %cst_26 {dimension_numbers = #tpu.dot_dimension_numbers<[1], [0], [0], [1], [0, 0, 1, 1], [], []>} : vector<8x4xf32>, vector<4x256xf32>, vector<8x256xf32> -> vector<8x256xf32>
    %26 = arith.addf %19, %25 : vector<8x256xf32>
    %c0_27 = arith.constant 0 : index
    %c0_28 = arith.constant 0 : index
    %c1_29 = arith.constant 1 : index
    %c1_30 = arith.constant 1 : index
    %27 = vector.load %arg1[%c0_27, %c0_28, %c1_29, %c1_30] : memref<1x4x18x18xf32, #tpu.memory_space<vmem>>, vector<1x4x16x16xf32>
    %28 = vector.shape_cast %27 : vector<1x4x16x16xf32> to vector<4x16x16xf32>
    %29 = vector.shape_cast %28 : vector<4x16x16xf32> to vector<4x256xf32>
    %c4 = arith.constant 4 : index
    %c0_31 = arith.constant 0 : index
    %c0_32 = arith.constant 0 : index
    %30 = vector.load %arg2[%c4, %c0_31, %c0_32] : memref<9x8x4xf32, #tpu.memory_space<vmem>>, vector<1x8x4xf32>
    %31 = vector.shape_cast %30 : vector<1x8x4xf32> to vector<8x4xf32>
    %cst_33 = arith.constant dense<0.000000e+00> : vector<8x256xf32>
    %32 = tpu.matmul %31, %29, %cst_33 {dimension_numbers = #tpu.dot_dimension_numbers<[1], [0], [0], [1], [0, 0, 1, 1], [], []>} : vector<8x4xf32>, vector<4x256xf32>, vector<8x256xf32> -> vector<8x256xf32>
    %33 = arith.addf %26, %32 : vector<8x256xf32>
    %c0_34 = arith.constant 0 : index
    %c0_35 = arith.constant 0 : index
    %c1_36 = arith.constant 1 : index
    %c2_37 = arith.constant 2 : index
    %34 = vector.load %arg1[%c0_34, %c0_35, %c1_36, %c2_37] : memref<1x4x18x18xf32, #tpu.memory_space<vmem>>, vector<1x4x16x16xf32>
    %35 = vector.shape_cast %34 : vector<1x4x16x16xf32> to vector<4x16x16xf32>
    %36 = vector.shape_cast %35 : vector<4x16x16xf32> to vector<4x256xf32>
    %c5 = arith.constant 5 : index
    %c0_38 = arith.constant 0 : index
    %c0_39 = arith.constant 0 : index
    %37 = vector.load %arg2[%c5, %c0_38, %c0_39] : memref<9x8x4xf32, #tpu.memory_space<vmem>>, vector<1x8x4xf32>
    %38 = vector.shape_cast %37 : vector<1x8x4xf32> to vector<8x4xf32>
    %cst_40 = arith.constant dense<0.000000e+00> : vector<8x256xf32>
    %39 = tpu.matmul %38, %36, %cst_40 {dimension_numbers = #tpu.dot_dimension_numbers<[1], [0], [0], [1], [0, 0, 1, 1], [], []>} : vector<8x4xf32>, vector<4x256xf32>, vector<8x256xf32> -> vector<8x256xf32>
    %40 = arith.addf %33, %39 : vector<8x256xf32>
    %c0_41 = arith.constant 0 : index
    %c0_42 = arith.constant 0 : index
    %c2_43 = arith.constant 2 : index
    %c0_44 = arith.constant 0 : index
    %41 = vector.load %arg1[%c0_41, %c0_42, %c2_43, %c0_44] : memref<1x4x18x18xf32, #tpu.memory_space<vmem>>, vector<1x4x16x16xf32>
    %42 = vector.shape_cast %41 : vector<1x4x16x16xf32> to vector<4x16x16xf32>
    %43 = vector.shape_cast %42 : vector<4x16x16xf32> to vector<4x256xf32>
    %c6 = arith.constant 6 : index
    %c0_45 = arith.constant 0 : index
    %c0_46 = arith.constant 0 : index
    %44 = vector.load %arg2[%c6, %c0_45, %c0_46] : memref<9x8x4xf32, #tpu.memory_space<vmem>>, vector<1x8x4xf32>
    %45 = vector.shape_cast %44 : vector<1x8x4xf32> to vector<8x4xf32>
    %cst_47 = arith.constant dense<0.000000e+00> : vector<8x256xf32>
    %46 = tpu.matmul %45, %43, %cst_47 {dimension_numbers = #tpu.dot_dimension_numbers<[1], [0], [0], [1], [0, 0, 1, 1], [], []>} : vector<8x4xf32>, vector<4x256xf32>, vector<8x256xf32> -> vector<8x256xf32>
    %47 = arith.addf %40, %46 : vector<8x256xf32>
    %c0_48 = arith.constant 0 : index
    %c0_49 = arith.constant 0 : index
    %c2_50 = arith.constant 2 : index
    %c1_51 = arith.constant 1 : index
    %48 = vector.load %arg1[%c0_48, %c0_49, %c2_50, %c1_51] : memref<1x4x18x18xf32, #tpu.memory_space<vmem>>, vector<1x4x16x16xf32>
    %49 = vector.shape_cast %48 : vector<1x4x16x16xf32> to vector<4x16x16xf32>
    %50 = vector.shape_cast %49 : vector<4x16x16xf32> to vector<4x256xf32>
    %c7 = arith.constant 7 : index
    %c0_52 = arith.constant 0 : index
    %c0_53 = arith.constant 0 : index
    %51 = vector.load %arg2[%c7, %c0_52, %c0_53] : memref<9x8x4xf32, #tpu.memory_space<vmem>>, vector<1x8x4xf32>
    %52 = vector.shape_cast %51 : vector<1x8x4xf32> to vector<8x4xf32>
    %cst_54 = arith.constant dense<0.000000e+00> : vector<8x256xf32>
    %53 = tpu.matmul %52, %50, %cst_54 {dimension_numbers = #tpu.dot_dimension_numbers<[1], [0], [0], [1], [0, 0, 1, 1], [], []>} : vector<8x4xf32>, vector<4x256xf32>, vector<8x256xf32> -> vector<8x256xf32>
    %54 = arith.addf %47, %53 : vector<8x256xf32>
    %c0_55 = arith.constant 0 : index
    %c0_56 = arith.constant 0 : index
    %c2_57 = arith.constant 2 : index
    %c2_58 = arith.constant 2 : index
    %55 = vector.load %arg1[%c0_55, %c0_56, %c2_57, %c2_58] : memref<1x4x18x18xf32, #tpu.memory_space<vmem>>, vector<1x4x16x16xf32>
    %56 = vector.shape_cast %55 : vector<1x4x16x16xf32> to vector<4x16x16xf32>
    %57 = vector.shape_cast %56 : vector<4x16x16xf32> to vector<4x256xf32>
    %c8 = arith.constant 8 : index
    %c0_59 = arith.constant 0 : index
    %c0_60 = arith.constant 0 : index
    %58 = vector.load %arg2[%c8, %c0_59, %c0_60] : memref<9x8x4xf32, #tpu.memory_space<vmem>>, vector<1x8x4xf32>
    %59 = vector.shape_cast %58 : vector<1x8x4xf32> to vector<8x4xf32>
    %cst_61 = arith.constant dense<0.000000e+00> : vector<8x256xf32>
    %60 = tpu.matmul %59, %57, %cst_61 {dimension_numbers = #tpu.dot_dimension_numbers<[1], [0], [0], [1], [0, 0, 1, 1], [], []>} : vector<8x4xf32>, vector<4x256xf32>, vector<8x256xf32> -> vector<8x256xf32>
    %61 = arith.addf %54, %60 : vector<8x256xf32>
    %c0_62 = arith.constant 0 : index
    %c0_63 = arith.constant 0 : index
    %c0_64 = arith.constant 0 : index
    %62 = vector.load %arg3[%c0_62, %c0_63, %c0_64] : memref<1x8x256xf32, #tpu.memory_space<vmem>>, vector<1x8x256xf32>
    %63 = vector.shape_cast %62 : vector<1x8x256xf32> to vector<8x256xf32>
    %64 = vector.shape_cast %61 : vector<8x256xf32> to vector<1x8x256xf32>
    tpu.vector_store %arg3[%c0_62, %c0_63, %c0_64], %64 {strides = array<i32>} : memref<1x8x256xf32, #tpu.memory_space<vmem>>, vector<1x8x256xf32>,
    %cst_65 = arith.constant dense<0.000000e+00> : vector<8xf32>
    %65 = vector.multi_reduction <add>, %61, %cst_65 [1] : vector<8x256xf32> to vector<8xf32>
    %66 = vector.shape_cast %65 : vector<8xf32> to vector<8x1xf32>
    %67 = arith.mulf %61, %61 : vector<8x256xf32>
    %cst_66 = arith.constant dense<0.000000e+00> : vector<8xf32>
    %68 = vector.multi_reduction <add>, %67, %cst_66 [1] : vector<8x256xf32> to vector<8xf32>
    %69 = vector.shape_cast %68 : vector<8xf32> to vector<8x1xf32>
    %70 = tpu.concatenate %66, %69 in 1 : vector<8x1xf32>, vector<8x1xf32> -> vector<8x2xf32>
    %c0_67 = arith.constant 0 : index
    %c0_68 = arith.constant 0 : index
    %c0_69 = arith.constant 0 : index
    %71 = vector.load %arg4[%c0_67, %c0_68, %c0_69] : memref<1x8x2xf32, #tpu.memory_space<vmem>>, vector<1x8x2xf32>
    %72 = vector.shape_cast %71 : vector<1x8x2xf32> to vector<8x2xf32>
    %73 = vector.shape_cast %70 : vector<8x2xf32> to vector<1x8x2xf32>
    tpu.vector_store %arg4[%c0_67, %c0_68, %c0_69], %73 {strides = array<i32>} : memref<1x8x2xf32, #tpu.memory_space<vmem>>, vector<1x8x2xf32>,
    return
  }
  func.func @transform_0(%arg0: i32) -> (i32, i32, i32, i32) {
    %c0_i32 = arith.constant 0 : i32
    %c0_i32_0 = arith.constant 0 : i32
    %c0_i32_1 = arith.constant 0 : i32
    %c0_i32_2 = arith.constant 0 : i32
    return %arg0, %c0_i32, %c0_i32_0, %c0_i32_1 : i32, i32, i32, i32
  }
  func.func @transform_1(%arg0: i32) -> (i32, i32, i32) {
    %c0_i32 = arith.constant 0 : i32
    %c0_i32_0 = arith.constant 0 : i32
    %c0_i32_1 = arith.constant 0 : i32
    %c0_i32_2 = arith.constant 0 : i32
    return %c0_i32, %c0_i32_0, %c0_i32_1 : i32, i32, i32
  }
  func.func @transform_2(%arg0: i32) -> (i32, i32, i32) {
    %c0_i32 = arith.constant 0 : i32
    %c0_i32_0 = arith.constant 0 : i32
    %c0_i32_1 = arith.constant 0 : i32
    return %arg0, %c0_i32, %c0_i32_0 : i32, i32, i32
  }
  func.func @transform_3(%arg0: i32) -> (i32, i32, i32) {
    %c0_i32 = arith.constant 0 : i32
    %c0_i32_0 = arith.constant 0 : i32
    %c0_i32_1 = arith.constant 0 : i32
    return %arg0, %c0_i32, %c0_i32_0 : i32, i32, i32
  }
}

module attributes {stable_mosaic.version = 11 : i64} {
  func.func @bn_apply_kernel(%arg0: i32, %arg1: memref<1x8x256xf32, #tpu.memory_space<vmem>>, %arg2: memref<8x1xf32, #tpu.memory_space<vmem>>, %arg3: memref<8x1xf32, #tpu.memory_space<vmem>>, %arg4: memref<1x8x256xf32, #tpu.memory_space<vmem>>) attributes {dimension_semantics = [#tpu.dimension_semantics<parallel>], iteration_bounds = array<i64: 2>, scalar_prefetch = 0 : i64, scratch_operands = 0 : i64, tpu.core_type = #tpu.core_type<tc>, window_params = [{transform_indices = @transform_0, window_bounds = array<i64: 1, 8, 256>}, {pipeline_mode = #tpu.pipeline_mode<synchronous>, transform_indices = @transform_1, window_bounds = array<i64: 8, 1>}, {pipeline_mode = #tpu.pipeline_mode<synchronous>, transform_indices = @transform_2, window_bounds = array<i64: 8, 1>}, {transform_indices = @transform_3, window_bounds = array<i64: 1, 8, 256>}]} {
    %c0 = arith.constant 0 : index
    %c0_0 = arith.constant 0 : index
    %c0_1 = arith.constant 0 : index
    %0 = vector.load %arg1[%c0, %c0_0, %c0_1] : memref<1x8x256xf32, #tpu.memory_space<vmem>>, vector<1x8x256xf32>
    %1 = vector.shape_cast %0 : vector<1x8x256xf32> to vector<8x256xf32>
    %c0_2 = arith.constant 0 : index
    %c0_3 = arith.constant 0 : index
    %2 = vector.load %arg2[%c0_2, %c0_3] : memref<8x1xf32, #tpu.memory_space<vmem>>, vector<8x1xf32>
    %3 = vector.broadcast %2 : vector<8x1xf32> to vector<8x256xf32>
    %4 = arith.mulf %1, %3 : vector<8x256xf32>
    %c0_4 = arith.constant 0 : index
    %c0_5 = arith.constant 0 : index
    %5 = vector.load %arg3[%c0_4, %c0_5] : memref<8x1xf32, #tpu.memory_space<vmem>>, vector<8x1xf32>
    %6 = vector.broadcast %5 : vector<8x1xf32> to vector<8x256xf32>
    %7 = arith.addf %4, %6 : vector<8x256xf32>
    %c0_6 = arith.constant 0 : index
    %c0_7 = arith.constant 0 : index
    %c0_8 = arith.constant 0 : index
    %8 = vector.load %arg4[%c0_6, %c0_7, %c0_8] : memref<1x8x256xf32, #tpu.memory_space<vmem>>, vector<1x8x256xf32>
    %9 = vector.shape_cast %8 : vector<1x8x256xf32> to vector<8x256xf32>
    %10 = vector.shape_cast %7 : vector<8x256xf32> to vector<1x8x256xf32>
    tpu.vector_store %arg4[%c0_6, %c0_7, %c0_8], %10 {strides = array<i32>} : memref<1x8x256xf32, #tpu.memory_space<vmem>>, vector<1x8x256xf32>,
    return
  }
  func.func @transform_0(%arg0: i32) -> (i32, i32, i32) {
    %c0_i32 = arith.constant 0 : i32
    %c0_i32_0 = arith.constant 0 : i32
    %c0_i32_1 = arith.constant 0 : i32
    return %arg0, %c0_i32, %c0_i32_0 : i32, i32, i32
  }
  func.func @transform_1(%arg0: i32) -> (i32, i32) {
    %c0_i32 = arith.constant 0 : i32
    %c0_i32_0 = arith.constant 0 : i32
    %c0_i32_1 = arith.constant 0 : i32
    return %c0_i32, %c0_i32_0 : i32, i32
  }
  func.func @transform_2(%arg0: i32) -> (i32, i32) {
    %c0_i32 = arith.constant 0 : i32
    %c0_i32_0 = arith.constant 0 : i32
    %c0_i32_1 = arith.constant 0 : i32
    return %c0_i32, %c0_i32_0 : i32, i32
  }
  func.func @transform_3(%arg0: i32) -> (i32, i32, i32) {
    %c0_i32 = arith.constant 0 : i32
    %c0_i32_0 = arith.constant 0 : i32
    %c0_i32_1 = arith.constant 0 : i32
    return %arg0, %c0_i32, %c0_i32_0 : i32, i32, i32
  }
}

</mosaic_0001>

<bundles_post_ra>
// kernel: conv_bn_forward.3
= control target key start
LH: loop header
LB: loop body
LE: loop exit
PB: predicated region body
PF: predicated region fallthrough
CT: control target
= control target key end

     0   :  { %s298_s12 = smov 0   ;;  %s321_s0 = inlined_call_operand.vmem [shape: f32[2,8,256], index: 0, kind: input, shape index: {}, may-alias: {0,3}]   ;;  %s322_s1 = inlined_call_operand.vmem [shape: f32[8,1], index: 1, kind: input, shape index: {}]   ;;  %s323_s2 = inlined_call_operand.vmem [shape: f32[8,1], index: 2, kind: input, shape index: {}]   ;;  %s324_s3 = inlined_call_operand.vmem [shape: f32[2,8,256], index: 3, kind: output, shape index: {}, may-alias: {0,3}]  }
   0x1 LB: > { %s246_s13 = sadd.s32 4294967295, %s275_s12   ;;  %p250_p0 = scmp.ge.s32.totalorder %s275_s12, 1  ;;  %s275_s12 = sphi %s298_s12, %s13_s12  }
   0x2   : > { %p137_p1 = scmp.lt.s32.totalorder %s275_s12, 3 }
   0x4   : > { %p138_p2 = pnand %p250_p0, %p137_p1 }
   0x5   : > { %v173_v0 = vld [vmem:[%s322_s1] sm:$0xff] (!%p138_p2)  ;;  %v277_v1 = vmov (!%p138_p2), 0   ;;  %p161_p3 = scmp.lt.s32.totalorder (!%p138_p2), %s246_s13, 1 }
   0x6   : > { %141 = sbr.rel (%p138_p2) target bundleno = 142 (0x8e), region = 32  ;;  %268 = vset.pattern.permute.xlu0 (!%p138_p2), %v277_v1  ;;  %v181_v2 = vld [vmem:[%s323_s2] sm:$0xff] (!%p138_p2) }
   0x7   : > { %176 = vperm.xlu0 (!%p138_p2), %268, %v173_v0  }
   0xb   : > { %184 = vperm.xlu0 (!%p138_p2), %268, %v181_v2  }
   0xd   : > { %s326_s13 = smov (!%p161_p3, %s246_s13), 1 }
   0xe   : > { %s257_s18 = sshll.u32 %s326_s13, 4 }
   0xf   : > { %s165_s21 = scalar_lea.vmem %s321_s0, %s257_s18  ;;  %s170_s24 = scalar_lea.vmem %s324_s3, %s257_s18 }
  0x10   : > { %v171_v4 = vld [vmem:[%s165_s21] sm:$0xff]  ;;  %v172_v5 = vld [vmem:[%s165_s21 + $0x8] sm:$0xff] }
  0x86   : > { %v177_v3 = vpop.permute.xlu0 %176 }
  0x87   : > { %v179_v6 = vmul.f32 %v177_v3, %v171_v4  ;;  %v180_v7 = vmul.f32 %v177_v3, %v172_v5 }
  0x8a   : > { %v185_v8 = vpop.permute.xlu0 %184 }
  0x8b   : > { %v187_v9 = vadd.f32 %v185_v8, %v179_v6  ;;  %v188_v10 = vadd.f32 %v185_v8, %v180_v7 }
  0x8d   : > { %189 = vst [vmem:[%s170_s24] sm:$0xff] %v187_v9  ;;  %190 = vst [vmem:[%s170_s24 + $0x8] sm:$0xff] %v188_v10 }
  0x8e PF: > { %s13_s12 = sadd.s32 1, %s275_s12  }
  0x8f   : > { %p10_p4 = scmp.ge.s32.totalorder %s13_s12, 4  }
  0x91   :  { %12 = sbr.rel (!%p10_p4) target bundleno = 1 (0x1), region = 62 }

// kernel: conv_bn_forward.2
= control target key start
LH: loop header
LB: loop body
LE: loop exit
PB: predicated region body
PF: predicated region fallthrough
CT: control target
= control target key end

     0   :  { %s3304_s12 = smov 0   ;;  %s4508_s0 = inlined_call_operand.vmem [shape: f32[2,4,18,18], index: 0, kind: input, shape index: {}]   ;;  %s4509_s1 = inlined_call_operand.vmem [shape: f32[9,8,4], index: 1, kind: input, shape index: {}]   ;;  %s4510_s2 = inlined_call_operand.vmem [shape: f32[2,8,256], index: 2, kind: output, shape index: {0}]   ;;  %s4511_s3 = inlined_call_operand.vmem [shape: f32[2,8,2], index: 3, kind: output, shape index: {1}]  }
   0x1 LB: > { %s3152_s13 = sadd.s32 4294967295, %s3270_s12   ;;  %p3156_p0 = scmp.ge.s32.totalorder %s3270_s12, 1  ;;  %s3270_s12 = sphi %s3304_s12, %s14_s12  }
   0x2   : > { %p140_p1 = scmp.lt.s32.totalorder %s3270_s12, 3 }
   0x4   : > { %p141_p2 = pnand %p3156_p0, %p140_p1 }
   0x6   : > { %144 = sbr.rel (%p141_p2) target bundleno = 883 (0x373), region = 28 }
   0xd   : > { %p168_p3 = scmp.lt.s32.totalorder %s3152_s13, 1  ;;  %v3272_v0 = vmov 1983009808   ;;  %v195_v2 = vlaneseq  ;;  %s3273_s18 = smov 127   ;;  %v3274_v9 = vmov 0.0   ;;  %vm382_vm0 = vcmask 130048  }
   0xe   : > { %v193_v1 = vunpack.c.l.s4 %v3272_v0  ;;  %1755 = vmatprep.mubr.f32.mxu0 %v3274_v9  ;;  %719 = vmatprep.mubr.f32.mxu1 %v3274_v9  ;;  %s3275_s19 = smov 126   ;;  %s3277_s20 = smov 32   ;;  %vm384_vm1 = vcmask 261120   ;;  %vm386_vm2 = vcmask 392192   ;;  %vm388_vm3 = vcmask 523264  }
   0xf   : > { %s4526_s13 = smov (!%p168_p3, %s3152_s13), 1  ;;  %v3322_v6 = vshrl.u32 %v195_v2, 7  ;;  %s3278_s21 = smov 64   ;;  %vm390_vm4 = vcmask 654336   ;;  %vm392_vm5 = vcmask 785408   ;;  %vm394_vm6 = vcmask 916480  }
  0x10   : > { %s3215_s14 = smul.u32 96, %s4526_s13  ;;  %v194_v5 = vunpack.c.0.s8 %v193_v1  ;;  %s3279_s22 = smov 96   ;;  %vm648_vm7 = vcmask 1043456   ;;  %vm644_vm8 = vcmask 31744   ;;  %vm3062_vm9 = vcmask 7168  }
  0x11   : > { %s3280_s23 = smov 16   ;;  %s3281_s24 = smov 48   ;;  %vm3064_vm10 = vcmask 15360  }
  0x12   : > { %s3318_s17 = scalar_lea.vmem %s4508_s0, %s3215_s14  ;;  %v3341_v14 = vsub.s32 %v194_v5, %v3322_v6  ;;  %s3282_s25 = smov 80  }
  0x13   : > { %v1439_v3 = vld [vmem:[%s3318_s17 + $0x39] sm:$0xff]  ;;  %v1435_v4 = vld [vmem:[%s3318_s17 + $0x9] sm:$0xff]  ;;  %v1441_v7 = vld [vmem:[%s3318_s17 + $0x51] sm:$0xff]  ;;  %s3283_s26 = smov 112  }
  0x14   : > { %1460 = vrot.lane.b32.xlu1 %v1439_v3, %s3273_s18  ;;  %1452 = vrot.lane.b32.xlu0 %v1435_v4, %s3273_s18  ;;  %v1437_v8 = vld [vmem:[%s3318_s17 + $0x21] sm:$0xff]  ;;  %v3334_v11 = vld [vmem:[%s3318_s17 + $0x50] sm:$0xff] }
  0x15   : > { %v3331_v10 = vld [vmem:[%s3318_s17 + $0x20] sm:$0xff]  ;;  %v3338_v13 = vld [vmem:[%s3318_s17 + $0x8] sm:$0xff]  ;;  %v3348_v17 = vld [vmem:[%s3318_s17 + $0x38] sm:$0xff] }
  0x16   : > { %v1436_v12 = vld [vmem:[%s3318_s17 + $0x19] sm:$0xff]  ;;  %v274_v15 = vcombine.low %v3331_v10, %v3334_v11  ;;  %v275_v16 = vcombine.high %v3331_v10, %v3334_v11  ;;  %v258_v18 = vcombine.low %v3338_v13, %v3348_v17  ;;  %v259_v19 = vcombine.high %v3338_v13, %v3348_v17  ;;  %v3360_v21 = vld [vmem:[%s3318_s17 + $0x48] sm:$0xff]  ;;  %v3374_v27 = vld [vmem:[%s3318_s17 + $0x30] sm:$0xff] }
  0x17   : > { %v3357_v20 = vld [vmem:[%s3318_s17 + $0x18] sm:$0xff]  ;;  %v1434_v22 = vld [vmem:[%s3318_s17 + $0x1] sm:$0xff]  ;;  %v1440_v31 = vld [vmem:[%s3318_s17 + $0x49] sm:$0xff] }
  0x18   : > { %1464 = vrot.lane.b32.xlu1 %v1441_v7, %s3273_s18  ;;  %1456 = vrot.lane.b32.xlu0 %v1437_v8, %s3273_s18  ;;  %v3364_v23 = vrot.slane %v275_v16, %v3341_v14  ;;  %v3367_v24 = vld [vmem:[%s3318_s17] sm:$0xff]  ;;  %v206_v25 = vcombine.low %v3357_v20, %v3360_v21  ;;  %v207_v26 = vcombine.high %v3357_v20, %v3360_v21  ;;  %v1438_v32 = vld [vmem:[%s3318_s17 + $0x31] sm:$0xff] }
  0x19   : > { %v3377_v28 = vrot.slane %v259_v19, %v3341_v14  ;;  %v190_v29 = vcombine.low %v3367_v24, %v3374_v27  ;;  %v191_v30 = vcombine.high %v3367_v24, %v3374_v27  ;;  %v2393_v39 = vld [vmem:[%s3318_s17 + $0xa] sm:$0xff]  ;;  %v2395_v40 = vld [vmem:[%s3318_s17 + $0x22] sm:$0xff]  ;;  %v2397_v41 = vld [vmem:[%s3318_s17 + $0x3a] sm:$0xff]  ;;  %v3463_v47 = vrot.slane %v274_v15, %v3341_v14 }
  0x1a   : > { %v3386_v33 = vrot.slane %v207_v26, %v3341_v14  ;;  %v2399_v42 = vld [vmem:[%s3318_s17 + $0x52] sm:$0xff]  ;;  %v2392_v43 = vld [vmem:[%s3318_s17 + $0x2] sm:$0xff]  ;;  %v2394_v44 = vld [vmem:[%s3318_s17 + $0x1a] sm:$0xff]  ;;  %v3469_v48 = vrot.slane %v258_v18, %v3341_v14  ;;  %v2170_v49 = vcombine.low %v2393_v39, %v2397_v41  ;;  %v3477_v51 = vrot.slane %v206_v25, %v3341_v14 }
  0x1b   : > { %v3395_v36 = vrot.slane %v191_v30, %v3341_v14  ;;  %v2396_v45 = vld [vmem:[%s3318_s17 + $0x32] sm:$0xff]  ;;  %v2398_v46 = vld [vmem:[%s3318_s17 + $0x4a] sm:$0xff]  ;;  %v2186_v50 = vcombine.low %v2395_v40, %v2399_v42  ;;  %v3480_v52 = vrot.slane %v190_v29, %v3341_v14 }
  0x1c   : > { %1454 = vrot.lane.b32.xlu1 %v1436_v12, %s3273_s18  ;;  %1450 = vrot.lane.b32.xlu0 %v1434_v22, %s3273_s18  ;;  %v290_v53 = vcombine.low %v3469_v48, %v3463_v47  ;;  %v3487_v54 = vrot.slane %v2170_v49, %v3341_v14  ;;  %v2102_v58 = vcombine.low %v2392_v43, %v2396_v45 }
  0x1d   : > { %v3490_v55 = vrot.slane %v2186_v50, %v3341_v14  ;;  %v222_v57 = vcombine.low %v3480_v52, %v3477_v51  ;;  %v2118_v59 = vcombine.low %v2394_v44, %v2398_v46  ;;  %v291_v62 = vcombine.high %v3469_v48, %v3463_v47 }
  0x1e   : > { %v3499_v60 = vrot.slane %v2102_v58, %v3341_v14  ;;  %v2103_v15 = vcombine.high %v2392_v43, %v2396_v45  ;;  %v2119_v16 = vcombine.high %v2394_v44, %v2398_v46  ;;  %v4514_v47 = vcombine.high %v3480_v52, %v3477_v51 }
  0x1f   : > { %v2202_v56 = vcombine.low %v3487_v54, %v3490_v55  ;;  %v3502_v61 = vrot.slane %v2118_v59, %v3341_v14  ;;  %v2203_v0 = vcombine.high %v3487_v54, %v3490_v55 }
  0x20   : > { %1462 = vrot.lane.b32.xlu1 %v1440_v31, %s3273_s18  ;;  %1458 = vrot.lane.b32.xlu0 %v1438_v32, %s3273_s18  ;;  %v3528_v18 = vrot.slane %v2119_v16, %v3341_v14 }
  0x21   : > { %v2134_v63 = vcombine.low %v3499_v60, %v3502_v61  ;;  %v4515_v54 = vcombine.high %v3499_v60, %v3502_v61 }
  0x24   : > { %418 = vrot.lane.b32.xlu1 %v3331_v10, %s3273_s18  ;;  %414 = vrot.lane.b32.xlu0 %v3338_v13, %s3273_s18 }
  0x28   : > { %426 = vrot.lane.b32.xlu1 %v3334_v11, %s3273_s18  ;;  %422 = vrot.lane.b32.xlu0 %v3348_v17, %s3273_s18 }
  0x2c   : > { %1786 = vrot.lane.b32.xlu1 %v1437_v8, %s3275_s19  ;;  %1782 = vrot.lane.b32.xlu0 %v1435_v4, %s3275_s19  ;;  %v2187_v4 = vcombine.high %v2395_v40, %v2399_v42 }
  0x30   : > { %1794 = vrot.lane.b32.xlu1 %v1441_v7, %s3275_s19  ;;  %1790 = vrot.lane.b32.xlu0 %v1439_v3, %s3275_s19  ;;  %v2171_v3 = vcombine.high %v2393_v39, %v2397_v41  ;;  %v3520_v7 = vrot.slane %v2187_v4, %v3341_v14 }
  0x32   : > { %v3517_v5 = vrot.slane %v2171_v3, %v3341_v14 }
  0x34   : > { %416 = vrot.lane.b32.xlu1 %v3357_v20, %s3273_s18  ;;  %412 = vrot.lane.b32.xlu0 %v3367_v24, %s3273_s18 }
  0x38   : > { %424 = vrot.lane.b32.xlu1 %v3360_v21, %s3273_s18  ;;  %420 = vrot.lane.b32.xlu0 %v3374_v27, %s3273_s18 }
  0x3c   : > { %1784 = vrot.lane.b32.xlu1 %v1436_v12, %s3275_s19  ;;  %1780 = vrot.lane.b32.xlu0 %v1434_v22, %s3275_s19 }
  0x40   : > { %1792 = vrot.lane.b32.xlu1 %v1440_v31, %s3275_s19  ;;  %1788 = vrot.lane.b32.xlu0 %v1438_v32, %s3275_s19 }
  0x44   : > { %824 = vrot.lane.b32.xlu0 %v3338_v13, %s3275_s19  ;;  %828 = vrot.lane.b32.xlu1 %v3331_v10, %s3275_s19  ;;  %v3276_v10 = vmov 1934713408  }
  0x48   : > { %832 = vrot.lane.b32.xlu0 %v3348_v17, %s3275_s19  ;;  %836 = vrot.lane.b32.xlu1 %v3334_v11, %s3275_s19  ;;  %v225_v11 = vunpack.c.l.s4 %v3276_v10  ;;  %v3525_v17 = vrot.slane %v2103_v15, %v3341_v14 }
  0x4c   : > { %2410 = vrot.lane.b32.xlu0 %v2393_v39, %s3273_s18  ;;  %2414 = vrot.lane.b32.xlu1 %v2395_v40, %s3273_s18 }
  0x50   : > { %2418 = vrot.lane.b32.xlu0 %v2397_v41, %s3273_s18  ;;  %2422 = vrot.lane.b32.xlu1 %v2399_v42, %s3273_s18 }
  0x54   : > { %822 = vrot.lane.b32.xlu0 %v3367_v24, %s3275_s19  ;;  %826 = vrot.lane.b32.xlu1 %v3357_v20, %s3275_s19  ;;  %v226_v20 = vunpack.c.0.s8 %v225_v11 }
  0x56   : > { %v3536_v32 = vsub.s32 %v226_v20, %v3322_v6 }
  0x58   : > { %830 = vrot.lane.b32.xlu0 %v3374_v27, %s3275_s19  ;;  %834 = vrot.lane.b32.xlu1 %v3360_v21, %s3275_s19  ;;  %v237_v48 = vrot.slane %v4514_v47, %v3536_v32  ;;  %v2149_v55 = vrot.slane %v4515_v54, %v3536_v32 }
  0x5a   : > { %v255_v51 = vcombine.high %v237_v48, %v3274_v9  ;;  %v2167_v61 = vcombine.high %v2149_v55, %v3274_v9 }
  0x5c   : > { %2408 = vrot.lane.b32.xlu0 %v2392_v43, %s3273_s18  ;;  %2412 = vrot.lane.b32.xlu1 %v2394_v44, %s3273_s18 }
  0x60   : > { %2416 = vrot.lane.b32.xlu0 %v2396_v45, %s3273_s18  ;;  %2420 = vrot.lane.b32.xlu1 %v2398_v46, %s3273_s18 }
  0x64   : > { %2740 = vrot.lane.b32.xlu0 %v2393_v39, %s3275_s19  ;;  %2744 = vrot.lane.b32.xlu1 %v2395_v40, %s3275_s19 }
  0x68   : > { %2748 = vrot.lane.b32.xlu0 %v2397_v41, %s3275_s19  ;;  %2752 = vrot.lane.b32.xlu1 %v2399_v42, %s3275_s19 }
  0x6c   : > { %2738 = vrot.lane.b32.xlu0 %v2392_v43, %s3275_s19  ;;  %2742 = vrot.lane.b32.xlu1 %v2394_v44, %s3275_s19 }
  0x70   : > { %2746 = vrot.lane.b32.xlu0 %v2396_v45, %s3275_s19  ;;  %2750 = vrot.lane.b32.xlu1 %v2398_v46, %s3275_s19 }
  0x86   : > { %v1461_v12 = vpop.permute.xlu1 %1460  ;;  %v1453_v13 = vpop.permute.xlu0 %1452 }
  0x87   : > { %v1542_v19 = vcombine.low %v1453_v13, %v1461_v12  ;;  %v1543_v21 = vcombine.high %v1453_v13, %v1461_v12 }
  0x89   : > { %v1550_v29 = vrot.slane %v1542_v19, %v3341_v14  ;;  %v1557_v39 = vrot.slane %v1543_v21, %v3341_v14 }
  0x8a   : > { %v1465_v22 = vpop.permute.xlu1 %1464  ;;  %v1457_v24 = vpop.permute.xlu0 %1456 }
  0x8b   : > { %v1558_v26 = vcombine.low %v1457_v24, %v1465_v22  ;;  %v1559_v27 = vcombine.high %v1457_v24, %v1465_v22 }
  0x8d   : > { %v1566_v30 = vrot.slane %v1558_v26, %v3341_v14  ;;  %v1573_v31 = vrot.slane %v1559_v27, %v3341_v14 }
  0x8e   : > { %v1455_v40 = vpop.permute.xlu1 %1454  ;;  %v1451_v41 = vpop.permute.xlu0 %1450 }
  0x8f   : > { %v1575_v42 = vcombine.high %v1550_v29, %v1566_v30  ;;  %v1590_v43 = vcombine.low %v1557_v39, %v1573_v31  ;;  %v1574_v12 = vcombine.low %v1550_v29, %v1566_v30  ;;  %v1591_v16 = vcombine.high %v1557_v39, %v1573_v31 }
  0x91   : > { %v1589_v44 = vrot.slane %v1575_v42, %v3536_v32  ;;  %v1598_v6 = vrot.slane %v1590_v43, %v3536_v32  ;;  %v1605_v27 = vrot.slane %v1591_v16, %v3536_v32  ;;  %v3562_v29 = vrot.slane %v1574_v12, %v3536_v32 }
  0x92   : > { %v1463_v45 = vpop.permute.xlu1 %1462  ;;  %v1459_v46 = vpop.permute.xlu0 %1458 }
  0x93   : > { %v1490_v49 = vcombine.low %v1455_v40, %v1463_v45  ;;  %v1491_v50 = vcombine.high %v1455_v40, %v1463_v45  ;;  %v1474_v58 = vcombine.low %v1451_v41, %v1459_v46  ;;  %v1475_v59 = vcombine.high %v1451_v41, %v1459_v46  ;;  %1643 = vrot.lane.b32.xlu0 %v1589_v44, %s3277_s20 }
  0x94   : > { %v1608_v30 = vcombine.high %v1598_v6, %v3274_v9 }
  0x95   : > { %v1498_v3 = vrot.slane %v1490_v49, %v3341_v14  ;;  %v1505_v4 = vrot.slane %v1491_v50, %v3341_v14  ;;  %v1482_v10 = vrot.slane %v1474_v58, %v3341_v14  ;;  %v1489_v11 = vrot.slane %v1475_v59, %v3341_v14 }
  0x96   : > { %v3546_v13 = vpop.permute.xlu1 %418  ;;  %v3548_v15 = vpop.permute.xlu0 %414  ;;  %v1606_v49 = vcombine.high %v3562_v29, %v3274_v9 }
  0x97   : > { %1651 = vrot.lane.b32.xlu0 %v1598_v6, %s3278_s21  ;;  %v1507_v20 = vcombine.high %v1482_v10, %v1498_v3  ;;  %v1522_v22 = vcombine.low %v1489_v11, %v1505_v4  ;;  %v1523_v43 = vcombine.high %v1489_v11, %v1505_v4  ;;  %v1607_v4 = vcombine.high %v1589_v44, %v3274_v9 }
  0x99   : > { %v3554_v21 = vrot.slane %v1507_v20, %v3536_v32  ;;  %v1530_v42 = vrot.slane %v1522_v22, %v3536_v32  ;;  %v1537_v50 = vrot.slane %v1523_v43, %v3536_v32  ;;  %v1506_v20 = vcombine.low %v1482_v10, %v1498_v3 }
  0x9a   : > { %v3556_v24 = vpop.permute.xlu1 %426  ;;  %v3558_v26 = vpop.permute.xlu0 %422 }
  0x9b   : > { %v520_v31 = vcombine.low %v3546_v13, %v3556_v24  ;;  %v504_v39 = vcombine.low %v3548_v15, %v3558_v26  ;;  %1615 = vrot.lane.b32.xlu1 %v3554_v21, %s3277_s20  ;;  %1659 = vrot.lane.b32.xlu0 %v1605_v27, %s3279_s22  ;;  %v3613_v10 = vrot.slane %v1506_v20, %v3536_v32 }
  0x9c   : > { %v1541_v2 = vcombine.high %v1537_v50, %v3274_v9 }
  0x9d   : > { %v528_v40 = vrot.slane %v520_v31, %v3341_v14  ;;  %v512_v41 = vrot.slane %v504_v39, %v3341_v14 }
  0x9e   : > { %v3576_v45 = vpop.permute.xlu1 %1786  ;;  %v3578_v46 = vpop.permute.xlu0 %1782 }
  0x9f   : > { %1623 = vrot.lane.b32.xlu1 %v1530_v42, %s3278_s21  ;;  %1639 = vrot.lane.b32.xlu0 %v1606_v49, %s3280_s23  ;;  %v537_v58 = vcombine.high %v512_v41, %v528_v40  ;;  %v536_v44 = vcombine.low %v512_v41, %v528_v40 }
  0xa1   : > { %v3599_v39 = vrot.slane %v537_v58, %v3536_v32  ;;  %v1609_v58 = vcombine.high %v1605_v27, %v3274_v9  ;;  %v3621_v6 = vrot.slane %v536_v44, %v3536_v32  ;;  %v1538_v27 = vcombine.high %v3613_v10, %v3274_v9 }
  0xa2   : > { %v3585_v59 = vpop.permute.xlu1 %1794  ;;  %v3587_v12 = vpop.permute.xlu0 %1790 }
  0xa3   : > { %v1888_v11 = vcombine.low %v3576_v45, %v3585_v59  ;;  %v1872_v16 = vcombine.low %v3578_v46, %v3587_v12  ;;  %1631 = vrot.lane.b32.xlu1 %v1537_v50, %s3279_s22  ;;  %1647 = vrot.lane.b32.xlu0 %v1607_v4, %s3281_s24  ;;  %v568_v44 = vcombine.high %v3621_v6, %v3274_v9 }
  0xa5   : > { %v1896_v22 = vrot.slane %v1888_v11, %v3341_v14  ;;  %v1880_v31 = vrot.slane %v1872_v16, %v3341_v14 }
  0xa6   : > { %v3601_v43 = vpop.permute.xlu1 %416  ;;  %v3603_v49 = vpop.permute.xlu0 %412 }
  0xa7   : > { %605 = vrot.lane.b32.xlu1 %v3599_v39, %s3277_s20  ;;  %v1905_v38 = vcombine.high %v1880_v31, %v1896_v22  ;;  %1655 = vrot.lane.b32.xlu0 %v1608_v30, %s3282_s25 }
  0xa9   : > { %v3610_v3 = vrot.slane %v1905_v38, %v3536_v32 }
  0xaa   : > { %v3615_v40 = vpop.permute.xlu1 %424  ;;  %v3617_v41 = vpop.permute.xlu0 %420 }
  0xab   : > { %v452_v4 = vcombine.low %v3601_v43, %v3615_v40  ;;  %v436_v30 = vcombine.low %v3603_v49, %v3617_v41  ;;  %1973 = vrot.lane.b32.xlu1 %v3610_v3, %s3277_s20  ;;  %1663 = vrot.lane.b32.xlu0 %v1609_v58, %s3283_s26  ;;  %v1539_v58 = vcombine.high %v3554_v21, %v3274_v9 }
  0xac   : > { %v1540_v21 = vcombine.high %v1530_v42, %v3274_v9  ;;  %v505_v42 = vcombine.high %v3548_v15, %v3558_v26  ;;  %v1873_v15 = vcombine.high %v3578_v46, %v3587_v12  ;;  %v453_v26 = vcombine.high %v3601_v43, %v3615_v40 }
  0xad   : > { %v460_v38 = vrot.slane %v452_v4, %v3341_v14  ;;  %v444_v11 = vrot.slane %v436_v30, %v3341_v14 }
  0xae   : > { %v3634_v16 = vpop.permute.xlu1 %1784  ;;  %v3636_v20 = vpop.permute.xlu0 %1780  ;;  %v1887_v46 = vrot.slane %v1873_v15, %v3341_v14 }
  0xaf   : > { %v468_v19 = vcombine.low %v444_v11, %v460_v38  ;;  %1611 = vrot.lane.b32.xlu1 %v1538_v27, %s3280_s23  ;;  %601 = vrot.lane.b32.xlu0 %v568_v44, %s3280_s23  ;;  %v1904_v27 = vcombine.low %v1880_v31, %v1896_v22 }
  0xb1   : > { %v3645_v4 = vrot.slane %v468_v19, %v3536_v32 }
  0xb2   : > { %v1793_v30 = vpop.permute.xlu1 %1792  ;;  %v1789_v35 = vpop.permute.xlu0 %1788 }
  0xb3   : > { %v1820_v25 = vcombine.low %v3634_v16, %v1793_v30  ;;  %v1804_v37 = vcombine.low %v3636_v20, %v1789_v35  ;;  %1619 = vrot.lane.b32.xlu1 %v1539_v58, %s3281_s24  ;;  %v500_v8 = vcombine.high %v3645_v4, %v3274_v9  ;;  %v3662_v58 = vrot.slane %v1904_v27, %v3536_v32 }
  0xb4   : > { %v1805_v40 = vcombine.high %v3636_v20, %v1789_v35 }
  0xb5   : > { %v1828_v44 = vrot.slane %v1820_v25, %v3341_v14  ;;  %v1812_v34 = vrot.slane %v1804_v37, %v3341_v14  ;;  %573 = vrot.lane.b32.xlu0 %v500_v8, %s3280_s23  ;;  %v469_v25 = vcombine.high %v444_v11, %v460_v38  ;;  %v521_v8 = vcombine.high %v3546_v13, %v3556_v24 }
  0xb6   : > { %v1936_v50 = vcombine.high %v3662_v58, %v3274_v9  ;;  %v3674_v22 = vpop.permute.xlu0 %824  ;;  %v519_v11 = vrot.slane %v505_v42, %v3341_v14  ;;  %v1889_v13 = vcombine.high %v3576_v45, %v3585_v59  ;;  %v569_v24 = vcombine.high %v3599_v39, %v3274_v9 }
  0xb7   : > { %v1836_v19 = vcombine.low %v1812_v34, %v1828_v44  ;;  %1627 = vrot.lane.b32.xlu1 %v1540_v21, %s3282_s25  ;;  %v1837_v31 = vcombine.high %v1812_v34, %v1828_v44  ;;  %v535_v38 = vrot.slane %v521_v8, %v3341_v14  ;;  %v437_v34 = vcombine.high %v3603_v49, %v3617_v41  ;;  %v3706_v21 = vpop.permute.xlu1 %828 }
  0xb8   : > { %v1903_v45 = vrot.slane %v1889_v13, %v3341_v14  ;;  %v1937_v59 = vcombine.high %v3610_v3, %v3274_v9  ;;  %v467_v39 = vrot.slane %v453_v26, %v3341_v14  ;;  %v1821_v49 = vcombine.high %v3634_v16, %v1793_v30 }
  0xb9   : > { %v3659_v1 = vrot.slane %v1836_v19, %v3536_v32  ;;  %v1851_v27 = vrot.slane %v1837_v31, %v3536_v32  ;;  %v552_v12 = vcombine.low %v519_v11, %v535_v38  ;;  %v451_v43 = vrot.slane %v437_v34, %v3341_v14 }
  0xba   : > { %v3693_v44 = vpop.permute.xlu0 %832  ;;  %v1920_v3 = vcombine.low %v1887_v46, %v1903_v45  ;;  %v1819_v8 = vrot.slane %v1805_v40, %v3341_v14  ;;  %v553_v26 = vcombine.high %v519_v11, %v535_v38 }
  0xbb   : > { %1635 = vrot.lane.b32.xlu1 %v1541_v2, %s3283_s26  ;;  %v1868_v37 = vcombine.high %v3659_v1, %v3274_v9  ;;  %v483_v2 = vrot.slane %v469_v25, %v3536_v32  ;;  %v560_v19 = vrot.slane %v552_v12, %v3536_v32  ;;  %v1835_v25 = vrot.slane %v1821_v49, %v3341_v14  ;;  %v3718_v30 = vpop.permute.xlu1 %836 }
  0xbc   : > { %v1869_v35 = vcombine.high %v1851_v27, %v3274_v9  ;;  %v484_v16 = vcombine.low %v451_v43, %v467_v39  ;;  %v1928_v20 = vrot.slane %v1920_v3, %v3536_v32  ;;  %v1921_v12 = vcombine.high %v1887_v46, %v1903_v45 }
  0xbd   : > { %1941 = vrot.lane.b32.xlu0 %v1868_v37, %s3280_s23  ;;  %v501_v41 = vcombine.high %v483_v2, %v3274_v9  ;;  %v570_v31 = vcombine.high %v560_v19, %v3274_v9  ;;  %v1853_v3 = vcombine.high %v1819_v8, %v1835_v25 }
  0xbe   : > { %v3710_v37 = vpop.permute.xlu0 %2410  ;;  %v492_v42 = vrot.slane %v484_v16, %v3536_v32  ;;  %v1935_v38 = vrot.slane %v1921_v12, %v3536_v32 }
  0xbf   : > { %1969 = vrot.lane.b32.xlu1 %v1936_v50, %s3280_s23  ;;  %v1852_v50 = vcombine.low %v1819_v8, %v1835_v25  ;;  %v3728_v15 = vpop.permute.xlu1 %2414  ;;  %v3764_v25 = vrot.slane %v290_v53, %v3536_v32 }
  0xc1   : > { %577 = vrot.lane.b32.xlu0 %v483_v2, %s3277_s20  ;;  %v1860_v13 = vrot.slane %v1852_v50, %v3536_v32  ;;  %v322_v53 = vcombine.high %v3764_v25, %v3274_v9 }
  0xc2   : > { %v3722_v2 = vpop.permute.xlu0 %2418 }
  0xc3   : > { %609 = vrot.lane.b32.xlu1 %v569_v24, %s3281_s24  ;;  %v1938_v24 = vcombine.high %v1928_v20, %v3274_v9  ;;  %v3738_v49 = vpop.permute.xlu1 %2422  ;;  %v1870_v40 = vcombine.high %v1860_v13, %v3274_v9 }
  0xc5   : > { %1945 = vrot.lane.b32.xlu0 %v1851_v27, %s3277_s20  ;;  %v502_v27 = vcombine.high %v492_v42, %v3274_v9 }
  0xc6   : > { %v3732_v34 = vpop.permute.xlu0 %822 }
  0xc7   : > { %1977 = vrot.lane.b32.xlu1 %v1937_v59, %s3281_s24  ;;  %v567_v59 = vrot.slane %v553_v26, %v3536_v32 }
  0xc9   : > { %581 = vrot.lane.b32.xlu0 %v501_v41, %s3281_s24  ;;  %v485_v41 = vcombine.high %v451_v43, %v467_v39  ;;  %v571_v45 = vcombine.high %v567_v59, %v3274_v9  ;;  %v1867_v39 = vrot.slane %v1853_v3, %v3536_v32  ;;  %v1939_v43 = vcombine.high %v1935_v38, %v3274_v9 }
  0xca   : > { %v4516_v3 = vcombine.low %v3377_v28, %v3364_v23 }
  0xcb   : > { %613 = vrot.lane.b32.xlu1 %v560_v19, %s3278_s21  ;;  %v3742_v19 = vpop.permute.xlu0 %830  ;;  %v499_v11 = vrot.slane %v485_v41, %v3536_v32  ;;  %v1871_v50 = vcombine.high %v1867_v39, %v3274_v9 }
  0xcc   : > { %v314_v60 = vrot.slane %v4516_v3, %v3536_v32 }
  0xcd   : > { %1949 = vrot.lane.b32.xlu0 %v1869_v35, %s3281_s24  ;;  %v3748_v35 = vpop.permute.xlu1 %826  ;;  %v503_v8 = vcombine.high %v499_v11, %v3274_v9 }
  0xcf   : > { %1981 = vrot.lane.b32.xlu1 %v1928_v20, %s3278_s21  ;;  %v3752_v46 = vpop.permute.xlu0 %2408  ;;  %v3772_v20 = vrot.slane %v2202_v56, %v3536_v32 }
  0xd1   : > { %585 = vrot.lane.b32.xlu0 %v492_v42, %s3278_s21  ;;  %v3758_v16 = vpop.permute.xlu1 %834  ;;  %v2234_v56 = vcombine.high %v3772_v20, %v3274_v9 }
  0xd3   : > { %617 = vrot.lane.b32.xlu1 %v570_v31, %s3282_s25  ;;  %v3774_v42 = vpop.permute.xlu0 %2416  ;;  %v3784_v31 = vrot.slane %v222_v57, %v3536_v32  ;;  %v3800_v57 = vrot.slane %v2134_v63, %v3536_v32  ;;  %v2217_v63 = vrot.slane %v2203_v0, %v3536_v32 }
  0xd5   : > { %1953 = vrot.lane.b32.xlu0 %v1860_v13, %s3278_s21  ;;  %v3789_v13 = vpop.permute.xlu1 %2412  ;;  %4513 = vst [vmem:[#allocation2_spill] sm:$0xff] %v3800_v57  ;;  %v2166_v12 = vcombine.high %v3800_v57, %v3274_v9  ;;  %v2235_v0 = vcombine.high %v2217_v63, %v3274_v9 }
  0xd7   : > { %1985 = vrot.lane.b32.xlu1 %v1938_v24, %s3282_s25  ;;  %v254_v24 = vcombine.high %v3784_v31, %v3274_v9  ;;  %v3794_v26 = vpop.permute.xlu0 %2740 }
  0xd9   : > { %589 = vrot.lane.b32.xlu0 %v502_v27, %s3282_s25  ;;  %v305_v27 = vrot.slane %v291_v62, %v3536_v32 }
  0xdb   : > { %621 = vrot.lane.b32.xlu1 %v567_v59, %s3279_s22  ;;  %v3808_v59 = vpop.permute.xlu1 %2420  ;;  %v323_v41 = vcombine.high %v305_v27, %v3274_v9 }
  0xdd   : > { %1957 = vrot.lane.b32.xlu0 %v1870_v40, %s3282_s25  ;;  %v3817_v40 = vpop.permute.xlu0 %2748 }
  0xdf   : > { %1989 = vrot.lane.b32.xlu1 %v1935_v38, %s3279_s22  ;;  %v3825_v62 = vpop.permute.xlu1 %2744 }
  0xe1   : > { %593 = vrot.lane.b32.xlu0 %v499_v11, %s3279_s22  ;;  %v3829_v38 = vpop.permute.xlu0 %2738 }
  0xe3   : > { %625 = vrot.lane.b32.xlu1 %v571_v45, %s3283_s26  ;;  %v3838_v52 = vpop.permute.xlu1 %2752 }
  0xe5   : > { %1961 = vrot.lane.b32.xlu0 %v1867_v39, %s3279_s22  ;;  %v3842_v11 = vpop.permute.xlu0 %2746  ;;  %v4517_v39 = vcombine.low %v3517_v5, %v3520_v7 }
  0xe7   : > { %1993 = vrot.lane.b32.xlu1 %v1939_v43, %s3283_s26  ;;  %v3850_v45 = vpop.permute.xlu1 %2742  ;;  %v2226_v43 = vrot.slane %v4517_v39, %v3536_v32 }
  0xe9   : > { %597 = vrot.lane.b32.xlu0 %v503_v8, %s3283_s26  ;;  %v2236_v47 = vcombine.high %v2226_v43, %v3274_v9 }
  0xeb   : > { %1965 = vrot.lane.b32.xlu1 %v1871_v50, %s3283_s26  ;;  %v4518_v50 = vcombine.low %v3395_v36, %v3386_v33 }
  0xed   : > { %355 = vrot.lane.b32.xlu0 %v322_v53, %s3280_s23  ;;  %v246_v53 = vrot.slane %v4518_v50, %v3536_v32  ;;  %v2500_v50 = vcombine.low %v3710_v37, %v3722_v2 }
  0xef   : > { %2267 = vrot.lane.b32.xlu1 %v2234_v56, %s3280_s23  ;;  %v324_v56 = vcombine.high %v314_v60, %v3274_v9 }
  0xf1   : > { %327 = vrot.lane.b32.xlu0 %v254_v24, %s3280_s23  ;;  %v3864_v24 = vpop.permute.xlu1 %2750 }
  0xf3   : > { %359 = vrot.lane.b32.xlu1 %v305_v27, %s3277_s20 }
  0xf5   : > { %2239 = vrot.lane.b32.xlu0 %v2166_v12, %s3280_s23  ;;  %v4519_v12 = vcombine.low %v3525_v17, %v3528_v18 }
  0xf7   : > { %2271 = vrot.lane.b32.xlu1 %v2217_v63, %s3277_s20  ;;  %v2158_v63 = vrot.slane %v4519_v12, %v3536_v32 }
  0xf9   : > { %331 = vrot.lane.b32.xlu0 %v237_v48, %s3277_s20  ;;  %v2168_v3 = vcombine.high %v2158_v63, %v3274_v9 }
  0xfb   : > { %363 = vrot.lane.b32.xlu1 %v323_v41, %s3281_s24  ;;  %v256_v41 = vcombine.high %v246_v53, %v3274_v9 }
  0xfd   : > { %2243 = vrot.lane.b32.xlu0 %v2149_v55, %s3277_s20  ;;  %v4520_v55 = vcombine.high %v3377_v28, %v3364_v23  ;;  %v4521_v23 = vcombine.high %v3517_v5, %v3520_v7  ;;  %v846_v7 = vcombine.low %v3732_v34, %v3742_v19 }
  0xff   : > { %2275 = vrot.lane.b32.xlu1 %v2235_v0, %s3281_s24  ;;  %v321_v0 = vrot.slane %v4520_v55, %v3536_v32  ;;  %v2233_v28 = vrot.slane %v4521_v23, %v3536_v32  ;;  %v862_v55 = vcombine.low %v3748_v35, %v3758_v16  ;;  %v3939_v23 = vrot.slane %v846_v7, %v3341_v14 }
 0x101   : > { %335 = vrot.lane.b32.xlu0 %v255_v51, %s3281_s24 }
 0x103   : > { %367 = vrot.lane.b32.xlu1 %v314_v60, %s3278_s21  ;;  %v914_v60 = vcombine.low %v3674_v22, %v3693_v44 }
 0x105   : > { %v1644_v8 = vpop.permute.xlu0 %1643  ;;  %2247 = vrot.lane.b32.xlu0 %v2167_v61, %s3281_s24  ;;  %v930_v61 = vcombine.low %v3706_v21, %v3718_v30 }
 0x107   : > { %2279 = vrot.lane.b32.xlu1 %v2226_v43, %s3278_s21  ;;  %v3912_v5 = vrot.slane %v930_v61, %v3341_v14 }
 0x109   : > { %v1652_v27 = vpop.permute.xlu0 %1651  ;;  %339 = vrot.lane.b32.xlu0 %v246_v53, %s3278_s21  ;;  %v2516_v53 = vcombine.low %v3728_v15, %v3738_v49 }
 0x10b   : > { %371 = vrot.lane.b32.xlu1 %v324_v56, %s3282_s25 }
 0x10d   : > { %v3873_v48 = vpop.permute.xlu1 %1615  ;;  %2251 = vrot.lane.b32.xlu0 %v2158_v63, %s3278_s21  ;;  %v1660_v54 = vpop.permute.xlu0 %1659  ;;  %v3909_v63 = vrot.slane %v914_v60, %v3341_v14  ;;  %v3926_v60 = vrot.slane %v2516_v53, %v3341_v14 }
 0x10f   : > { %2283 = vrot.lane.b32.xlu1 %v2236_v47, %s3282_s25 }
 0x111   : > { %v3882_v51 = vpop.permute.xlu1 %1623  ;;  %343 = vrot.lane.b32.xlu0 %v256_v41, %s3282_s25  ;;  %v1640_v39 = vpop.permute.xlu0 %1639 }
 0x112   : > { %v1673_v43 = vsel %vm382_vm0, %v3562_v29, %v1640_v39  ;;  %v4522_v29 = vcombine.high %v3395_v36, %v3386_v33  ;;  %v325_v33 = vcombine.high %v321_v0, %v3274_v9  ;;  %v3923_v36 = vrot.slane %v2500_v50, %v3341_v14 }
 0x113   : > { %375 = vrot.lane.b32.xlu1 %v321_v0, %s3279_s22  ;;  %v1674_v47 = vsel %vm384_vm1, %v1673_v43, %v1644_v8  ;;  %v4523_v8 = vcombine.high %v3525_v17, %v3528_v18  ;;  %v2237_v43 = vcombine.high %v2233_v28, %v3274_v9  ;;  %v946_v0 = vcombine.low %v3909_v63, %v3912_v5 }
 0x114   : > { %v253_v12 = vrot.slane %v4522_v29, %v3536_v32  ;;  %v3943_v29 = vrot.slane %v862_v55, %v3341_v14  ;;  %v2448_v17 = vcombine.low %v3789_v13, %v3808_v59 }
 0x115   : > { %v3901_v56 = vpop.permute.xlu1 %1631  ;;  %2255 = vrot.lane.b32.xlu0 %v2168_v3, %s3282_s25  ;;  %v1648_v41 = vpop.permute.xlu0 %1647  ;;  %v2165_v39 = vrot.slane %v4523_v8, %v3536_v32  ;;  %v3960_v8 = vrot.slane %v946_v0, %v3536_v32 }
 0x116   : > { %v1675_v3 = vsel %vm386_vm2, %v1674_v47, %v1648_v41  ;;  %v2432_v47 = vcombine.low %v3752_v46, %v3774_v42  ;;  %v257_v7 = vcombine.high %v253_v12, %v3274_v9 }
 0x117   : > { %2287 = vrot.lane.b32.xlu1 %v2233_v28, %s3279_s22  ;;  %v1676_v50 = vsel %vm388_vm3, %v1675_v3, %v1652_v27  ;;  %v2532_v28 = vcombine.low %v3923_v36, %v3926_v60  ;;  %v2169_v3 = vcombine.high %v2165_v39, %v3274_v9 }
 0x119   : > { %v3928_v61 = vpop.permute.xlu1 %605  ;;  %347 = vrot.lane.b32.xlu0 %v253_v12, %s3279_s22  ;;  %v1656_v53 = vpop.permute.xlu0 %1655 }
 0x11a   : > { %v1677_v18 = vsel %vm390_vm4, %v1676_v50, %v1656_v53  ;;  %v2440_v50 = vrot.slane %v2432_v47, %v3341_v14  ;;  %v2456_v53 = vrot.slane %v2448_v17, %v3341_v14  ;;  %v978_v47 = vcombine.high %v3960_v8, %v3274_v9 }
 0x11b   : > { %379 = vrot.lane.b32.xlu1 %v325_v33, %s3283_s26  ;;  %v1678_v55 = vsel %vm392_vm5, %v1677_v18, %v1660_v54  ;;  %v878_v33 = vcombine.low %v3939_v23, %v3943_v29  ;;  %v3971_v54 = vrot.slane %v2532_v28, %v3536_v32 }
 0x11c   : > { %v2464_v0 = vcombine.low %v2440_v50, %v2456_v53 }
 0x11d   : > { %v3953_v27 = vpop.permute.xlu1 %1973  ;;  %2259 = vrot.lane.b32.xlu0 %v2165_v39, %s3279_s22  ;;  %v1664_v41 = vpop.permute.xlu0 %1663 }
 0x11e   : > { %v1679_v57 = vsel %vm394_vm6, %v1678_v55, %v1664_v41 }
 0x11f   : > { %2291 = vrot.lane.b32.xlu1 %v2237_v43, %s3283_s26  ;;  %3177 = vmatprep.subr.msk.mxu0 %vm648_vm7, %v1679_v57  ;;  %v3979_v43 = vrot.slane %v878_v33, %v3536_v32  ;;  %v947_v57 = vcombine.high %v3909_v63, %v3912_v5  ;;  %v3995_v63 = vrot.slane %v2464_v0, %v3536_v32 }
 0x121   : > { %v1612_v12 = vpop.permute.xlu1 %1611  ;;  %351 = vrot.lane.b32.xlu0 %v257_v7, %s3283_s26  ;;  %v3989_v7 = vpop.permute.xlu0 %601  ;;  %v910_v41 = vcombine.high %v3979_v43, %v3274_v9 }
 0x122   : > { %v1666_v39 = vsel %vm382_vm0, %v3613_v10, %v1612_v12  ;;  %v2564_v10 = vcombine.high %v3971_v54, %v3274_v9  ;;  %v879_v12 = vcombine.high %v3939_v23, %v3943_v29  ;;  %v3176_v29 = vld [vmem:[%s4509_s1 + $0x20] sm:$0xff] }
 0x123   : > { %2263 = vrot.lane.b32.xlu1 %v2169_v3, %s3283_s26  ;;  %v1667_v17 = vsel %vm384_vm1, %v1666_v39, %v3873_v48  ;;  %v2533_v48 = vcombine.high %v3923_v36, %v3926_v60  ;;  %v961_v3 = vrot.slane %v947_v57, %v3536_v32  ;;  %v2496_v36 = vcombine.high %v3995_v63, %v3274_v9 }
 0x124   : > { %v931_v60 = vcombine.high %v3706_v21, %v3718_v30 }
 0x125   : > { %v1620_v18 = vpop.permute.xlu1 %1619  ;;  %1011 = vrot.lane.b32.xlu0 %v978_v47, %s3280_s23  ;;  %v2547_v47 = vrot.slane %v2533_v48, %v3536_v32 }
 0x126   : > { %v1668_v28 = vsel %vm386_vm2, %v1667_v17, %v1620_v18  ;;  %v2465_v17 = vcombine.high %v2440_v50, %v2456_v53  ;;  %v945_v30 = vrot.slane %v931_v60, %v3341_v14  ;;  %v2517_v50 = vcombine.high %v3728_v15, %v3738_v49 }
 0x127   : > { %2597 = vrot.lane.b32.xlu1 %v2564_v10, %s3280_s23  ;;  %v1669_v5 = vsel %vm388_vm3, %v1668_v28, %v3882_v51  ;;  %v4006_v39 = vpop.permute.xlu0 %573  ;;  %v915_v51 = vcombine.high %v3674_v22, %v3693_v44  ;;  %v893_v44 = vrot.slane %v879_v12, %v3536_v32  ;;  %v979_v18 = vcombine.high %v961_v3, %v3274_v9 }
 0x128   : > { %v847_v10 = vcombine.high %v3732_v34, %v3742_v19  ;;  %v863_v28 = vcombine.high %v3748_v35, %v3758_v16  ;;  %v2565_v34 = vcombine.high %v2547_v47, %v3274_v9  ;;  %v2433_v16 = vcombine.high %v3752_v46, %v3774_v42 }
 0x129   : > { %v1628_v55 = vpop.permute.xlu1 %1627  ;;  %983 = vrot.lane.b32.xlu0 %v910_v41, %s3280_s23  ;;  %v4029_v21 = vrot.slane %v915_v51, %v3341_v14  ;;  %v2531_v41 = vrot.slane %v2517_v50, %v3341_v14 }
 0x12a   : > { %v1670_v33 = vsel %vm390_vm4, %v1669_v5, %v1628_v55  ;;  %v861_v19 = vrot.slane %v847_v10, %v3341_v14  ;;  %v877_v35 = vrot.slane %v863_v28, %v3341_v14  ;;  %v2449_v5 = vcombine.high %v3789_v13, %v3808_v59  ;;  %v3252_v28 = vld [vmem:[%s3318_s17 + $0x9] ss:$48 sps:$4 sm:$0xff]  }
 0x12b   : > { %1015 = vrot.lane.b32.xlu1 %v961_v3, %s3277_s20  ;;  %v1671_v23 = vsel %vm392_vm5, %v1670_v33, %v3901_v56  ;;  %v2501_v56 = vcombine.high %v3710_v37, %v3722_v2  ;;  %v2479_v2 = vrot.slane %v2465_v17, %v3536_v32  ;;  %v962_v15 = vcombine.low %v4029_v21, %v945_v30 }
 0x12c   : > { %v911_v3 = vcombine.high %v893_v44, %v3274_v9  ;;  %v894_v51 = vcombine.low %v861_v19, %v877_v35  ;;  %v2447_v60 = vrot.slane %v2433_v16, %v3341_v14  ;;  %v2463_v46 = vrot.slane %v2449_v5, %v3341_v14 }
 0x12d   : > { %v1636_v0 = vpop.permute.xlu1 %1635  ;;  %2569 = vrot.lane.b32.xlu0 %v2496_v36, %s3280_s23  ;;  %v2515_v49 = vrot.slane %v2501_v56, %v3341_v14  ;;  %v970_v36 = vrot.slane %v962_v15, %v3536_v32  ;;  %v2497_v13 = vcombine.high %v2479_v2, %v3274_v9  ;;  %v963_v50 = vcombine.high %v4029_v21, %v945_v30 }
 0x12e   : > { %v1672_v57 = vsel %vm394_vm6, %v1671_v23, %v1636_v0  ;;  %v4105_v30 = vrot.slane %v3252_v28, %v3341_v14 }
 0x12f   : > { %2601 = vrot.lane.b32.xlu1 %v2547_v47, %s3277_s20  ;;  %3178 = vmatpush1.msk.msra.mxu0 %vm648_vm7, %v1672_v57  ;;  %v4025_v22 = vpop.permute.xlu0 %1941  ;;  %v2548_v33 = vcombine.low %v2515_v49, %v2531_v41  ;;  %v2480_v47 = vcombine.low %v2447_v60, %v2463_v46  ;;  %v980_v17 = vcombine.high %v970_v36, %v3274_v9 }
 0x130   : > { %3179 = vmatmul.mubr.msk.f32.vlgmr.msra.gmra.mrb[0].mxu0 %vm644_vm8, %v3176_v29  ;;  %v902_v29 = vrot.slane %v894_v51, %v3536_v32  ;;  %v2549_v16 = vcombine.high %v2515_v49, %v2531_v41  ;;  %v977_v21 = vrot.slane %v963_v50, %v3536_v32  ;;  %v2481_v49 = vcombine.high %v2447_v60, %v2463_v46  ;;  %v3256_v41 = vld [vmem:[%s3318_s17 + $0x1] ss:$48 sps:$4 sm:$0xff]  }
 0x131   : > { %v4037_v53 = vpop.permute.xlu1 %1969  ;;  %987 = vrot.lane.b32.xlu0 %v893_v44, %s3277_s20  ;;  %2085 = vmatprep.mubr.f32.mxu0 %v3274_v9  ;;  %v2556_v0 = vrot.slane %v2548_v33, %v3536_v32  ;;  %v2488_v56 = vrot.slane %v2480_v47, %v3536_v32  ;;  %v895_v33 = vcombine.high %v861_v19, %v877_v35 }
 0x132   : > { %v2846_v47 = vcombine.low %v3825_v62, %v3838_v52  ;;  %v2563_v19 = vrot.slane %v2549_v16, %v3536_v32  ;;  %v635_v60 = vsel %vm382_vm0, %v3621_v6, %v3989_v7  ;;  %v2495_v50 = vrot.slane %v2481_v49, %v3536_v32 }
 0x133   : > { %1019 = vrot.lane.b32.xlu1 %v979_v18, %s3281_s24  ;;  %v4047_v37 = vpop.permute.xlu0 %577  ;;  %v2566_v10 = vcombine.high %v2556_v0, %v3274_v9  ;;  %v2498_v51 = vcombine.high %v2488_v56, %v3274_v9  ;;  %v636_v7 = vsel %vm384_vm1, %v635_v60, %v3928_v61  ;;  %v2778_v49 = vcombine.low %v3850_v45, %v3864_v24 }
 0x134   : > { %v4141_v6 = vrot.slane %v2846_v47, %v3341_v14 }
 0x135   : > { %v4053_v48 = vpop.permute.xlu1 %609  ;;  %2573 = vrot.lane.b32.xlu0 %v2479_v2, %s3277_s20  ;;  %v3254_v2 = vld [vmem:[%s3318_s17 + $0x21] ss:$48 sps:$4 sm:$0xff]  }
 0x137   : > { %2605 = vrot.lane.b32.xlu1 %v2565_v34, %s3281_s24  ;;  %v4064_v55 = vpop.permute.xlu0 %1945  ;;  %v912_v34 = vcombine.high %v902_v29, %v3274_v9 }
 0x139   : > { %v4067_v12 = vpop.permute.xlu1 %1977  ;;  %991 = vrot.lane.b32.xlu0 %v911_v3, %s3281_s24  ;;  %v4108_v3 = vrot.slane %v3254_v2, %v3341_v14 }
 0x13b   : > { %1023 = vrot.lane.b32.xlu1 %v970_v36, %s3278_s21  ;;  %v4074_v42 = vpop.permute.xlu0 %581  ;;  %v1244_v35 = vcombine.low %v4105_v30, %v4108_v3 }
 0x13d   : > { %v614_v59 = vpop.permute.xlu1 %613  ;;  %2577 = vrot.lane.b32.xlu0 %v2497_v13, %s3281_s24  ;;  %v3258_v13 = vld [vmem:[%s3318_s17 + $0x19] ss:$48 sps:$4 sm:$0xff]   ;;  %v4147_v16 = vrot.slane %v1244_v35, %v3536_v32  ;;  %v2499_v35 = vcombine.high %v2495_v50, %v3274_v9 }
 0x13e   : > { %v4135_v28 = vrot.slane %v3258_v13, %v3341_v14  ;;  %v2567_v13 = vcombine.high %v2563_v19, %v3274_v9 }
 0x13f   : > { %2609 = vrot.lane.b32.xlu1 %v2556_v0, %s3278_s21  ;;  %v4080_v23 = vpop.permute.xlu0 %1949  ;;  %v2830_v0 = vcombine.low %v3794_v26, %v3817_v40 }
 0x141   : > { %v4083_v57 = vpop.permute.xlu1 %1981  ;;  %995 = vrot.lane.b32.xlu0 %v902_v29, %s3278_s21  ;;  %v4138_v2 = vrot.slane %v2830_v0, %v3341_v14 }
 0x143   : > { %1027 = vrot.lane.b32.xlu1 %v980_v17, %s3282_s25  ;;  %v4088_v44 = vpop.permute.xlu0 %585  ;;  %v909_v17 = vrot.slane %v895_v33, %v3536_v32  ;;  %v2003_v33 = vsel %vm382_vm0, %v3662_v58, %v4037_v53  ;;  %v2862_v53 = vcombine.low %v4138_v2, %v4141_v6 }
 0x145   : > { %v618_v18 = vpop.permute.xlu1 %617  ;;  %2581 = vrot.lane.b32.xlu0 %v2488_v56, %s3278_s21  ;;  %v981_v56 = vcombine.high %v977_v21, %v3274_v9  ;;  %v913_v47 = vcombine.high %v909_v17, %v3274_v9 }
 0x147   : > { %2613 = vrot.lane.b32.xlu1 %v2566_v10, %s3282_s25  ;;  %v4097_v15 = vpop.permute.xlu0 %1953  ;;  %v4132_v10 = vrot.slane %v3256_v41, %v3341_v14 }
 0x149   : > { %v4100_v5 = vpop.permute.xlu1 %1985  ;;  %999 = vrot.lane.b32.xlu0 %v912_v34, %s3282_s25  ;;  %v1176_v58 = vcombine.low %v4132_v10, %v4135_v28 }
 0x14b   : > { %1031 = vrot.lane.b32.xlu1 %v977_v21, %s3279_s22  ;;  %v4111_v36 = vpop.permute.xlu0 %589  ;;  %v2762_v21 = vcombine.low %v3829_v38, %v3842_v11 }
 0x14d   : > { %v622_v29 = vpop.permute.xlu1 %621  ;;  %2585 = vrot.lane.b32.xlu0 %v2498_v51, %s3282_s25  ;;  %v637_v51 = vsel %vm386_vm2, %v636_v7, %v4053_v48  ;;  %v2004_v48 = vsel %vm384_vm1, %v2003_v33, %v3953_v27 }
 0x14e   : > { %v638_v61 = vsel %vm388_vm3, %v637_v51, %v614_v59 }
 0x14f   : > { %2617 = vrot.lane.b32.xlu1 %v2563_v19, %s3279_s22  ;;  %v1958_v46 = vpop.permute.xlu0 %1957  ;;  %v639_v0 = vsel %vm390_vm4, %v638_v61, %v618_v18  ;;  %v1276_v18 = vcombine.high %v4147_v16, %v3274_v9  ;;  %v4175_v19 = vrot.slane %v2762_v21, %v3341_v14 }
 0x150   : > { %v640_v59 = vsel %vm392_vm5, %v639_v0, %v622_v29  ;;  %v4184_v29 = vrot.slane %v2778_v49, %v3341_v14 }
 0x151   : > { %v1990_v34 = vpop.permute.xlu1 %1989  ;;  %1003 = vrot.lane.b32.xlu0 %v909_v17, %s3279_s22  ;;  %v628_v17 = vsel %vm382_vm0, %v3645_v4, %v4006_v39  ;;  %v1996_v4 = vsel %vm382_vm0, %v3659_v1, %v4025_v22  ;;  %v4209_v1 = vrot.slane %v2862_v53, %v3536_v32 }
 0x153   : > { %1035 = vrot.lane.b32.xlu1 %v981_v56, %s3283_s26  ;;  %v594_v41 = vpop.permute.xlu0 %593  ;;  %v2005_v56 = vsel %vm386_vm2, %v2004_v48, %v4067_v12  ;;  %v2863_v48 = vcombine.high %v4138_v2, %v4141_v6 }
 0x154   : > { %v2006_v7 = vsel %vm388_vm3, %v2005_v56, %v4083_v57  ;;  %v1997_v57 = vsel %vm384_vm1, %v1996_v4, %v4064_v55  ;;  %v1245_v55 = vcombine.high %v4105_v30, %v4108_v3  ;;  %v3260_v56 = vld [vmem:[%s3318_s17 + $0xd] ss:$48 sps:$4 sm:$0xff]  }
 0x155   : > { %v626_v60 = vpop.permute.xlu1 %625  ;;  %2589 = vrot.lane.b32.xlu0 %v2495_v50, %s3279_s22  ;;  %v629_v50 = vsel %vm384_vm1, %v628_v17, %v4047_v37  ;;  %v2007_v12 = vsel %vm390_vm4, %v2006_v7, %v4100_v5  ;;  %v4200_v37 = vrot.slane %v1176_v58, %v3536_v32  ;;  %v1998_v22 = vsel %vm386_vm2, %v1997_v57, %v4080_v23 }
 0x156   : > { %v641_v27 = vsel %vm394_vm6, %v640_v59, %v626_v60  ;;  %v630_v39 = vsel %vm386_vm2, %v629_v50, %v4074_v42  ;;  %v2008_v51 = vsel %vm392_vm5, %v2007_v12, %v1990_v34  ;;  %v1999_v34 = vsel %vm388_vm3, %v1998_v22, %v4097_v15 }
 0x157   : > { %2621 = vrot.lane.b32.xlu1 %v2567_v13, %s3283_s26  ;;  %3162 = vmatprep.subr.msk.mxu1 %vm648_vm7, %v641_v27  ;;  %v1962_v21 = vpop.permute.xlu0 %1961  ;;  %v631_v33 = vsel %vm388_vm3, %v630_v39, %v4088_v44  ;;  %v2794_v44 = vcombine.low %v4175_v19, %v4184_v29  ;;  %v2000_v13 = vsel %vm390_vm4, %v1999_v34, %v1958_v46  ;;  %v3261_v27 = vld [vmem:[%s3318_s17 + $0x25] ss:$48 sps:$4 sm:$0xff]  }
 0x158   : > { %v632_v42 = vsel %vm390_vm4, %v631_v33, %v4111_v36  ;;  %v3161_v36 = vld [vmem:[%s4509_s1 + $0x8] sm:$0xff]  ;;  %v2001_v3 = vsel %vm392_vm5, %v2000_v13, %v1962_v21  ;;  %v2894_v15 = vcombine.high %v4209_v1, %v3274_v9  ;;  %v1259_v58 = vrot.slane %v1245_v55, %v3536_v32 }
 0x159   : > { %v1994_v49 = vpop.permute.xlu1 %1993  ;;  %1007 = vrot.lane.b32.xlu0 %v913_v47, %s3283_s26  ;;  %v633_v61 = vsel %vm392_vm5, %v632_v42, %v594_v41  ;;  %v1208_v41 = vcombine.high %v4200_v37, %v3274_v9  ;;  %v3180_v47 = vld [vmem:[%s4509_s1 + $0x28] sm:$0xff]  ;;  %v4248_v53 = vrot.slane %v2794_v44, %v3536_v32  ;;  %v1177_v60 = vcombine.high %v4132_v10, %v4135_v28 }
 0x15a   : > { %v2009_v5 = vsel %vm394_vm6, %v2008_v51, %v1994_v49  ;;  %v2877_v6 = vrot.slane %v2863_v48, %v3536_v32  ;;  %v2795_v28 = vcombine.high %v4175_v19, %v4184_v29  ;;  %v1277_v7 = vcombine.high %v1259_v58, %v3274_v9  ;;  %v3262_v19 = vld [vmem:[%s3318_s17 + $0x5] ss:$48 sps:$4 sm:$0xff]   ;;  %v3263_v29 = vld [vmem:[%s3318_s17 + $0x1d] ss:$48 sps:$4 sm:$0xff]  }
 0x15b   : > { %2593 = vrot.lane.b32.xlu1 %v2499_v35, %s3283_s26  ;;  %3181 = vmatprep.subr.msk.mxu0 %vm648_vm7, %v2009_v5  ;;  %v598_v23 = vpop.permute.xlu0 %597  ;;  %v2826_v17 = vcombine.high %v4248_v53, %v3274_v9  ;;  %v1191_v10 = vrot.slane %v1177_v60, %v3536_v32  ;;  %v1227_v21 = vrot.slane %v3260_v56, %v3341_v14 }
 0x15c   : > { %v634_v30 = vsel %vm394_vm6, %v633_v61, %v598_v23  ;;  %v1243_v4 = vrot.slane %v3261_v27, %v3341_v14  ;;  %v2831_v39 = vcombine.high %v3794_v26, %v3817_v40  ;;  %v2847_v12 = vcombine.high %v3825_v62, %v3838_v52 }
 0x15d   : > { %v1966_v0 = vpop.permute.xlu1 %1965  ;;  %3163 = vmatpush1.msk.msra.mxu1 %vm648_vm7, %v634_v30  ;;  %1309 = vrot.lane.b32.xlu0 %v1276_v18, %s3280_s23  ;;  %v2809_v51 = vrot.slane %v2795_v28, %v3536_v32  ;;  %v2895_v62 = vcombine.high %v2877_v6, %v3274_v9  ;;  %v1209_v52 = vcombine.high %v1191_v10, %v3274_v9 }
 0x15e   : > { %v2002_v46 = vsel %vm394_vm6, %v2001_v3, %v1966_v0  ;;  %3164 = vmatmul.mubr.msk.f32.vlgmr.msra.gmra.mrb[0].mxu1 %vm644_vm8, %v3161_v36  ;;  %v1260_v49 = vcombine.low %v1227_v21, %v1243_v4  ;;  %v2845_v22 = vrot.slane %v2831_v39, %v3341_v14  ;;  %v2861_v26 = vrot.slane %v2847_v12, %v3341_v14 }
 0x15f   : > { %2927 = vrot.lane.b32.xlu1 %v2894_v15, %s3280_s23  ;;  %3182 = vmatpush1.msk.msra.mxu0 %vm648_vm7, %v2002_v46  ;;  %v4244_v35 = vpop.permute.xlu0 %355  ;;  %v1159_v42 = vrot.slane %v3262_v19, %v3341_v14  ;;  %v1175_v5 = vrot.slane %v3263_v29, %v3341_v14  ;;  %v2763_v55 = vcombine.high %v3829_v38, %v3842_v11 }
 0x160   : > { %3183 = vmatmul.mubr.msk.f32.vlgmr.msra.gmra.mrb[0].mxu0 %vm644_vm8, %v3180_v47  ;;  %799 = vmatprep.mubr.f32.mxu1 %v3274_v9  ;;  %v2779_v44 = vcombine.high %v3850_v45, %v3864_v24  ;;  %v1268_v61 = vrot.slane %v1260_v49, %v3536_v32  ;;  %v2878_v23 = vcombine.low %v2845_v22, %v2861_v26 }
 0x161   : > { %v4254_v59 = vpop.permute.xlu1 %2267  ;;  %1281 = vrot.lane.b32.xlu0 %v1208_v41, %s3280_s23  ;;  %2383 = vmatprep.mubr.f32.mxu0 %v3274_v9  ;;  %v1192_v13 = vcombine.low %v1159_v42, %v1175_v5  ;;  %v2777_v30 = vrot.slane %v2763_v55, %v3341_v14  ;;  %v2827_v11 = vcombine.high %v2809_v51, %v3274_v9 }
 0x162   : > { %v2793_v3 = vrot.slane %v2779_v44, %v3341_v14  ;;  %v2886_v24 = vrot.slane %v2878_v23, %v3536_v32  ;;  %v1278_v14 = vcombine.high %v1268_v61, %v3274_v9  ;;  %v1261_v48 = vcombine.high %v1227_v21, %v1243_v4 }
 0x163   : > { %1313 = vrot.lane.b32.xlu1 %v1259_v58, %s3277_s20  ;;  %v4261_v18 = vpop.permute.xlu0 %327  ;;  %v1200_v0 = vrot.slane %v1192_v13, %v3536_v32  ;;  %v2301_v44 = vsel %vm382_vm0, %v3772_v20, %v4254_v59 }
 0x164   : > { %v2810_v15 = vcombine.low %v2777_v30, %v2793_v3  ;;  %v2811_v29 = vcombine.high %v2777_v30, %v2793_v3  ;;  %v4524_v3 = vld [vmem:[#allocation2_spill] sm:$0xff] }
 0x165   : > { %v4267_v2 = vpop.permute.xlu1 %359  ;;  %2899 = vrot.lane.b32.xlu0 %v2826_v17, %s3280_s23  ;;  %v2896_v17 = vcombine.high %v2886_v24, %v3274_v9  ;;  %v1210_v56 = vcombine.high %v1200_v0, %v3274_v9 }
 0x166   : > { %v2818_v58 = vrot.slane %v2810_v15, %v3536_v32  ;;  %v2825_v55 = vrot.slane %v2811_v29, %v3536_v32 }
 0x167   : > { %2931 = vrot.lane.b32.xlu1 %v2877_v6, %s3277_s20  ;;  %v4275_v50 = vpop.permute.xlu0 %2239  ;;  %v1275_v6 = vrot.slane %v1261_v48, %v3536_v32 }
 0x168   : > { %v2828_v4 = vcombine.high %v2818_v58, %v3274_v9 }
 0x169   : > { %v4284_v57 = vpop.permute.xlu1 %2271  ;;  %1285 = vrot.lane.b32.xlu0 %v1191_v10, %s3277_s20  ;;  %v2879_v10 = vcombine.high %v2845_v22, %v2861_v26  ;;  %v1279_v49 = vcombine.high %v1275_v6, %v3274_v9  ;;  %v396_v22 = vsel %vm382_vm0, %v3764_v25, %v4244_v35 }
 0x16a   : > { %v397_v26 = vsel %vm384_vm1, %v396_v22, %v4267_v2  ;;  %v2302_v35 = vsel %vm384_vm1, %v2301_v44, %v4284_v57 }
 0x16b   : > { %1317 = vrot.lane.b32.xlu1 %v1277_v7, %s3281_s24  ;;  %v4290_v33 = vpop.permute.xlu0 %331  ;;  %v1193_v7 = vcombine.high %v1159_v42, %v1175_v5  ;;  %v2893_v12 = vrot.slane %v2879_v10, %v3536_v32 }
 0x16d   : > { %v364_v40 = vpop.permute.xlu1 %363  ;;  %2903 = vrot.lane.b32.xlu0 %v2809_v51, %s3277_s20  ;;  %v1207_v19 = vrot.slane %v1193_v7, %v3536_v32  ;;  %v383_v32 = vsel %vm382_vm0, %v3784_v31, %v4261_v18  ;;  %s3198_s20 = sshll.u32 %s4526_s13, 4 }
 0x16e   : > { %v385_v57 = vsel %vm384_vm1, %v383_v32, %v4290_v33  ;;  %s177_s23 = scalar_lea.vmem %s4510_s2, %s3198_s20 }
 0x16f   : > { %2935 = vrot.lane.b32.xlu1 %v2895_v62, %s3281_s24  ;;  %v4305_v34 = vpop.permute.xlu0 %2243  ;;  %v1211_v23 = vcombine.high %v1207_v19, %v3274_v9 }
 0x171   : > { %v4308_v36 = vpop.permute.xlu1 %2275  ;;  %1289 = vrot.lane.b32.xlu0 %v1209_v52, %s3281_s24  ;;  %v398_v52 = vsel %vm386_vm2, %v397_v26, %v364_v40  ;;  %v2897_v40 = vcombine.high %v2893_v12, %v3274_v9 }
 0x172   : > { %v2303_v20 = vsel %vm386_vm2, %v2302_v35, %v4308_v36 }
 0x173   : > { %1321 = vrot.lane.b32.xlu1 %v1268_v61, %s3278_s21  ;;  %v4314_v38 = vpop.permute.xlu0 %335 }
 0x174   : > { %v387_v31 = vsel %vm386_vm2, %v385_v57, %v4314_v38 }
 0x175   : > { %v368_v45 = vpop.permute.xlu1 %367  ;;  %2907 = vrot.lane.b32.xlu0 %v2827_v11, %s3281_s24  ;;  %v2294_v11 = vsel %vm382_vm0, %v4524_v3, %v4275_v50  ;;  %s3160_s24 = sshll.u32 %s4526_s13, 3 }
 0x176   : > { %v399_v42 = vsel %vm388_vm3, %v398_v52, %v368_v45  ;;  %v2295_v36 = vsel %vm384_vm1, %v2294_v11, %v4305_v34  ;;  %s181_s27 = scalar_lea.vmem %s4511_s3, %s3160_s24 }
 0x177   : > { %2939 = vrot.lane.b32.xlu1 %v2886_v24, %s3278_s21  ;;  %v4321_v41 = vpop.permute.xlu0 %2247 }
 0x178   : > { %v2296_v50 = vsel %vm386_vm2, %v2295_v36, %v4321_v41 }
 0x179   : > { %v2280_v47 = vpop.permute.xlu1 %2279  ;;  %1293 = vrot.lane.b32.xlu0 %v1200_v0, %s3278_s21  ;;  %v2829_v0 = vcombine.high %v2825_v55, %v3274_v9 }
 0x17a   : > { %v2304_v13 = vsel %vm388_vm3, %v2303_v20, %v2280_v47 }
 0x17b   : > { %1325 = vrot.lane.b32.xlu1 %v1278_v14, %s3282_s25  ;;  %v340_v46 = vpop.permute.xlu0 %339 }
 0x17c   : > { %v389_v33 = vsel %vm388_vm3, %v387_v31, %v340_v46  ;;  %v403_v46 = vld [vmem:[%s4509_s1] sm:$0xff] }
 0x17d   : > { %v372_v60 = vpop.permute.xlu1 %371  ;;  %2911 = vrot.lane.b32.xlu0 %v2818_v58, %s3278_s21 }
 0x17e   : > { %v400_v25 = vsel %vm390_vm4, %v399_v42, %v372_v60 }
 0x17f   : > { %2943 = vrot.lane.b32.xlu1 %v2896_v17, %s3282_s25  ;;  %v2252_v27 = vpop.permute.xlu0 %2251  ;;  %v3184_v17 = vld [vmem:[%s4509_s1 + $0x30] sm:$0xff] }
 0x180   : > { %v2297_v14 = vsel %vm388_vm3, %v2296_v50, %v2252_v27 }
 0x181   : > { %v2284_v28 = vpop.permute.xlu1 %2283  ;;  %1297 = vrot.lane.b32.xlu0 %v1210_v56, %s3282_s25 }
 0x182   : > { %v2305_v18 = vsel %vm390_vm4, %v2304_v13, %v2284_v28 }
 0x183   : > { %1329 = vrot.lane.b32.xlu1 %v1275_v6, %s3279_s22  ;;  %v344_v21 = vpop.permute.xlu0 %343 }
 0x184   : > { %v391_v15 = vsel %vm390_vm4, %v389_v33, %v344_v21 }
 0x185   : > { %v376_v39 = vpop.permute.xlu1 %375  ;;  %2915 = vrot.lane.b32.xlu0 %v2828_v4, %s3282_s25 }
 0x186   : > { %v401_v2 = vsel %vm392_vm5, %v400_v25, %v376_v39 }
 0x187   : > { %2947 = vrot.lane.b32.xlu1 %v2893_v12, %s3279_s22  ;;  %v2256_v51 = vpop.permute.xlu0 %2255 }
 0x188   : > { %v2298_v58 = vsel %vm390_vm4, %v2297_v14, %v2256_v51 }
 0x189   : > { %v2288_v62 = vpop.permute.xlu1 %2287  ;;  %1301 = vrot.lane.b32.xlu0 %v1207_v19, %s3279_s22 }
 0x18a   : > { %v2306_v45 = vsel %vm392_vm5, %v2305_v18, %v2288_v62 }
 0x18b   : > { %1333 = vrot.lane.b32.xlu1 %v1279_v49, %s3283_s26  ;;  %v348_v5 = vpop.permute.xlu0 %347 }
 0x18c   : > { %v393_v34 = vsel %vm392_vm5, %v391_v15, %v348_v5 }
 0x18d   : > { %v380_v61 = vpop.permute.xlu1 %379  ;;  %2919 = vrot.lane.b32.xlu0 %v2825_v55, %s3279_s22 }
 0x18e   : > { %v402_v59 = vsel %vm394_vm6, %v401_v2, %v380_v61 }
 0x18f   : > { %2951 = vrot.lane.b32.xlu1 %v2897_v40, %s3283_s26  ;;  %3165 = vmatprep.subr.msk.mxu1 %vm648_vm7, %v402_v59  ;;  %v2260_v30 = vpop.permute.xlu0 %2259 }
 0x190   : > { %v2299_v48 = vsel %vm392_vm5, %v2298_v58, %v2260_v30 }
 0x191   : > { %v2292_v24 = vpop.permute.xlu1 %2291  ;;  %1305 = vrot.lane.b32.xlu0 %v1211_v23, %s3283_s26 }
 0x192   : > { %v2307_v38 = vsel %vm394_vm6, %v2306_v45, %v2292_v24 }
 0x193   : > { %2923 = vrot.lane.b32.xlu1 %v2829_v0, %s3283_s26  ;;  %3185 = vmatprep.subr.msk.mxu0 %vm648_vm7, %v2307_v38  ;;  %v352_v47 = vpop.permute.xlu0 %351 }
 0x194   : > { %v395_v41 = vsel %vm394_vm6, %v393_v34, %v352_v47  ;;  %v3168_v47 = vld [vmem:[%s4509_s1 + $0x10] sm:$0xff] }
 0x195   : > { %v2264_v60 = vpop.permute.xlu1 %2263  ;;  %3166 = vmatpush1.msk.msra.mxu1 %vm648_vm7, %v395_v41 }
 0x196   : > { %v2300_v56 = vsel %vm394_vm6, %v2299_v48, %v2264_v60  ;;  %3167 = vmatmul.mubr.msk.f32.vlgmr.msra.gmra.mrb[0].mxu1 %vm644_vm8, %v403_v46  ;;  %v3188_v60 = vld [vmem:[%s4509_s1 + $0x38] sm:$0xff] }
 0x197   : > { %3186 = vmatpush1.msk.msra.mxu0 %vm648_vm7, %v2300_v56  ;;  %v1012_v27 = vpop.permute.xlu0 %1011  ;;  %1127 = vmatprep.mubr.f32.mxu1 %v3274_v9 }
 0x198   : > { %3187 = vmatmul.mubr.msk.f32.vlgmr.msra.gmra.mrb[0].mxu0 %vm644_vm8, %v3184_v17  ;;  %v1045_v25 = vsel %vm382_vm0, %v3960_v8, %v1012_v27 }
 0x199   : > { %v2598_v6 = vpop.permute.xlu1 %2597  ;;  %2713 = vmatprep.mubr.f32.mxu0 %v3274_v9 }
 0x19a   : > { %v2631_v32 = vsel %vm382_vm0, %v3971_v54, %v2598_v6 }
 0x19b   : > { %v984_v10 = vpop.permute.xlu0 %983 }
 0x19c   : > { %v1038_v8 = vsel %vm382_vm0, %v3979_v43, %v984_v10 }
 0x19d   : > { %v1016_v28 = vpop.permute.xlu1 %1015 }
 0x19e   : > { %v1046_v35 = vsel %vm384_vm1, %v1045_v25, %v1016_v28 }
 0x19f   : > { %v2570_v7 = vpop.permute.xlu0 %2569 }
 0x1a0   : > { %v2624_v18 = vsel %vm382_vm0, %v3995_v63, %v2570_v7 }
 0x1a1   : > { %v2602_v21 = vpop.permute.xlu1 %2601 }
 0x1a2   : > { %v2632_v59 = vsel %vm384_vm1, %v2631_v32, %v2602_v21 }
 0x1a3   : > { %v988_v4 = vpop.permute.xlu0 %987 }
 0x1a4   : > { %v1039_v11 = vsel %vm384_vm1, %v1038_v8, %v988_v4 }
 0x1a5   : > { %v1020_v39 = vpop.permute.xlu1 %1019 }
 0x1a6   : > { %v1047_v61 = vsel %vm386_vm2, %v1046_v35, %v1020_v39 }
 0x1a7   : > { %v2574_v12 = vpop.permute.xlu0 %2573 }
 0x1a8   : > { %v2625_v43 = vsel %vm384_vm1, %v2624_v18, %v2574_v12 }
 0x1a9   : > { %v2606_v19 = vpop.permute.xlu1 %2605 }
 0x1aa   : > { %v2633_v30 = vsel %vm386_vm2, %v2632_v59, %v2606_v19 }
 0x1ab   : > { %v992_v29 = vpop.permute.xlu0 %991 }
 0x1ac   : > { %v1040_v36 = vsel %vm386_vm2, %v1039_v11, %v992_v29 }
 0x1ad   : > { %v1024_v51 = vpop.permute.xlu1 %1023 }
 0x1ae   : > { %v1048_v40 = vsel %vm388_vm3, %v1047_v61, %v1024_v51 }
 0x1af   : > { %v2578_v49 = vpop.permute.xlu0 %2577 }
 0x1b0   : > { %v2626_v50 = vsel %vm386_vm2, %v2625_v43, %v2578_v49 }
 0x1b1   : > { %v2610_v22 = vpop.permute.xlu1 %2609 }
 0x1b2   : > { %v2634_v31 = vsel %vm388_vm3, %v2633_v30, %v2610_v22 }
 0x1b3   : > { %v996_v26 = vpop.permute.xlu0 %995 }
 0x1b4   : > { %v1041_v45 = vsel %vm388_vm3, %v1040_v36, %v996_v26 }
 0x1b5   : > { %v1028_v62 = vpop.permute.xlu1 %1027 }
 0x1b6   : > { %v1049_v20 = vsel %vm390_vm4, %v1048_v40, %v1028_v62 }
 0x1b7   : > { %v2582_v52 = vpop.permute.xlu0 %2581 }
 0x1b8   : > { %v2627_v14 = vsel %vm388_vm3, %v2626_v50, %v2582_v52  ;;  %v3172_v50 = vld [vmem:[%s4509_s1 + $0x18] sm:$0xff] }
 0x1b9   : > { %v2614_v42 = vpop.permute.xlu1 %2613 }
 0x1ba   : > { %v2635_v33 = vsel %vm390_vm4, %v2634_v31, %v2614_v42 }
 0x1bb   : > { %v1000_v5 = vpop.permute.xlu0 %999 }
 0x1bc   : > { %v1042_v15 = vsel %vm390_vm4, %v1041_v45, %v1000_v5 }
 0x1bd   : > { %v1032_v55 = vpop.permute.xlu1 %1031 }
 0x1be   : > { %v1050_v57 = vsel %vm392_vm5, %v1049_v20, %v1032_v55 }
 0x1bf   : > { %v2586_v44 = vpop.permute.xlu0 %2585 }
 0x1c0   : > { %v2628_v46 = vsel %vm390_vm4, %v2627_v14, %v2586_v44 }
 0x1c1   : > { %v2618_v2 = vpop.permute.xlu1 %2617 }
 0x1c2   : > { %v2636_v24 = vsel %vm392_vm5, %v2635_v33, %v2618_v2 }
 0x1c3   : > { %v1004_v23 = vpop.permute.xlu0 %1003 }
 0x1c4   : > { %v1043_v63 = vsel %vm392_vm5, %v1042_v15, %v1004_v23 }
 0x1c5   : > { %v1036_v13 = vpop.permute.xlu1 %1035 }
 0x1c6   : > { %v1051_v3 = vsel %vm394_vm6, %v1050_v57, %v1036_v13 }
 0x1c7   : > { %3169 = vmatprep.subr.msk.mxu1 %vm648_vm7, %v1051_v3  ;;  %v2590_v54 = vpop.permute.xlu0 %2589 }
 0x1c8   : > { %v2629_v41 = vsel %vm392_vm5, %v2628_v46, %v2590_v54 }
 0x1c9   : > { %v2622_v0 = vpop.permute.xlu1 %2621 }
 0x1ca   : > { %v2637_v38 = vsel %vm394_vm6, %v2636_v24, %v2622_v0 }
 0x1cb   : > { %3189 = vmatprep.subr.msk.mxu0 %vm648_vm7, %v2637_v38  ;;  %v1008_v34 = vpop.permute.xlu0 %1007 }
 0x1cc   : > { %v1044_v58 = vsel %vm394_vm6, %v1043_v63, %v1008_v34  ;;  %v3192_v34 = vld [vmem:[%s4509_s1 + $0x40] sm:$0xff] }
 0x1cd   : > { %v2594_v48 = vpop.permute.xlu1 %2593  ;;  %3170 = vmatpush1.msk.msra.mxu1 %vm648_vm7, %v1044_v58 }
 0x1ce   : > { %v2630_v17 = vsel %vm394_vm6, %v2629_v41, %v2594_v48  ;;  %3171 = vmatmul.mubr.msk.f32.vlgmr.msra.gmra.mrb[0].mxu1 %vm644_vm8, %v3168_v47 }
 0x1cf   : > { %3190 = vmatpush1.msk.msra.mxu0 %vm648_vm7, %v2630_v17  ;;  %v1310_v56 = vpop.permute.xlu0 %1309  ;;  %1425 = vmatprep.mubr.f32.mxu1 %v3274_v9 }
 0x1d0   : > { %3191 = vmatmul.mubr.msk.f32.vlgmr.msra.gmra.mrb[0].mxu0 %vm644_vm8, %v3188_v60 }
 0x1d1   : > { %v2928_v27 = vpop.permute.xlu1 %2927  ;;  %3043 = vmatprep.mubr.f32.mxu0 %v3274_v9  ;;  %v1343_v9 = vsel %vm382_vm0, %v4147_v16, %v1310_v56 }
 0x1d2   : > { %v2961_v40 = vsel %vm382_vm0, %v4209_v1, %v2928_v27 }
 0x1d3   : > { %v1282_v6 = vpop.permute.xlu0 %1281 }
 0x1d4   : > { %v1336_v16 = vsel %vm382_vm0, %v4200_v37, %v1282_v6 }
 0x1d5   : > { %v1314_v10 = vpop.permute.xlu1 %1313 }
 0x1d6   : > { %v1344_v44 = vsel %vm384_vm1, %v1343_v9, %v1314_v10 }
 0x1d7   : > { %v2900_v28 = vpop.permute.xlu0 %2899 }
 0x1d8   : > { %v2954_v3 = vsel %vm382_vm0, %v4248_v53, %v2900_v28 }
 0x1d9   : > { %v2932_v7 = vpop.permute.xlu1 %2931 }
 0x1da   : > { %v2962_v32 = vsel %vm384_vm1, %v2961_v40, %v2932_v7 }
 0x1db   : > { %v1286_v21 = vpop.permute.xlu0 %1285 }
 0x1dc   : > { %v1337_v8 = vsel %vm384_vm1, %v1336_v16, %v1286_v21 }
 0x1dd   : > { %v1318_v4 = vpop.permute.xlu1 %1317 }
 0x1de   : > { %v1345_v35 = vsel %vm386_vm2, %v1344_v44, %v1318_v4 }
 0x1df   : > { %v2904_v39 = vpop.permute.xlu0 %2903 }
 0x1e0   : > { %v2955_v37 = vsel %vm384_vm1, %v2954_v3, %v2904_v39 }
 0x1e1   : > { %v2936_v12 = vpop.permute.xlu1 %2935 }
 0x1e2   : > { %v2963_v57 = vsel %vm386_vm2, %v2962_v32, %v2936_v12 }
 0x1e3   : > { %v1290_v19 = vpop.permute.xlu0 %1289 }
 0x1e4   : > { %v1338_v11 = vsel %vm386_vm2, %v1337_v8, %v1290_v19 }
 0x1e5   : > { %v1322_v29 = vpop.permute.xlu1 %1321 }
 0x1e6   : > { %v1346_v2 = vsel %vm388_vm3, %v1345_v35, %v1322_v29 }
 0x1e7   : > { %v2908_v51 = vpop.permute.xlu0 %2907 }
 0x1e8   : > { %v2956_v33 = vsel %vm386_vm2, %v2955_v37, %v2908_v51 }
 0x1e9   : > { %v2940_v49 = vpop.permute.xlu1 %2939 }
 0x1ea   : > { %v2964_v30 = vsel %vm388_vm3, %v2963_v57, %v2940_v49 }
 0x1eb   : > { %v1294_v22 = vpop.permute.xlu0 %1293 }
 0x1ec   : > { %v1339_v54 = vsel %vm388_vm3, %v1338_v11, %v1294_v22 }
 0x1ed   : > { %v1326_v26 = vpop.permute.xlu1 %1325 }
 0x1ee   : > { %v1347_v23 = vsel %vm390_vm4, %v1346_v2, %v1326_v26 }
 0x1ef   : > { %v2912_v62 = vpop.permute.xlu0 %2911 }
 0x1f0   : > { %v2957_v53 = vsel %vm388_vm3, %v2956_v33, %v2912_v62 }
 0x1f1   : > { %v2944_v52 = vpop.permute.xlu1 %2943 }
 0x1f2   : > { %v2965_v31 = vsel %vm390_vm4, %v2964_v30, %v2944_v52 }
 0x1f3   : > { %v1298_v42 = vpop.permute.xlu0 %1297 }
 0x1f4   : > { %v1340_v43 = vsel %vm390_vm4, %v1339_v54, %v1298_v42 }
 0x1f5   : > { %v1330_v5 = vpop.permute.xlu1 %1329 }
 0x1f6   : > { %v1348_v20 = vsel %vm392_vm5, %v1347_v23, %v1330_v5 }
 0x1f7   : > { %v2916_v55 = vpop.permute.xlu0 %2915 }
 0x1f8   : > { %v2958_v15 = vsel %vm390_vm4, %v2957_v53, %v2916_v55 }
 0x1f9   : > { %v2948_v25 = vpop.permute.xlu1 %2947 }
 0x1fa   : > { %v2966_v18 = vsel %vm392_vm5, %v2965_v31, %v2948_v25 }
 0x1fb   : > { %v1302_v61 = vpop.permute.xlu0 %1301 }
 0x1fc   : > { %v1341_v24 = vsel %vm392_vm5, %v1340_v43, %v1302_v61 }
 0x1fd   : > { %v1334_v59 = vpop.permute.xlu1 %1333 }
 0x1fe   : > { %v1349_v13 = vsel %vm394_vm6, %v1348_v20, %v1334_v59 }
 0x1ff   : > { %3173 = vmatprep.subr.msk.mxu1 %vm648_vm7, %v1349_v13  ;;  %v2920_v1 = vpop.permute.xlu0 %2919 }
 0x200   : > { %v2959_v14 = vsel %vm392_vm5, %v2958_v15, %v2920_v1 }
 0x201   : > { %v2952_v36 = vpop.permute.xlu1 %2951 }
 0x202   : > { %v2967_v45 = vsel %vm394_vm6, %v2966_v18, %v2952_v36 }
 0x203   : > { %3193 = vmatprep.subr.msk.mxu0 %vm648_vm7, %v2967_v45  ;;  %v1306_v0 = vpop.permute.xlu0 %1305 }
 0x204   : > { %v1342_v38 = vsel %vm394_vm6, %v1341_v24, %v1306_v0 }
 0x205   : > { %v2924_v63 = vpop.permute.xlu1 %2923  ;;  %3174 = vmatpush1.msk.msra.mxu1 %vm648_vm7, %v1342_v38 }
 0x206   : > { %v2960_v47 = vsel %vm394_vm6, %v2959_v14, %v2924_v63  ;;  %3175 = vmatmul.mubr.msk.f32.vlgmr.msra.gmra.mrb[0].mxu1 %vm644_vm8, %v3172_v50 }
 0x207   : > { %3194 = vmatpush1.msk.msra.mxu0 %vm648_vm7, %v2960_v47 }
 0x208   : > { %3195 = vmatmul.mubr.msk.f32.vlgmr.msra.gmra.mrb[0].mxu0 %vm644_vm8, %v3192_v34 }
 0x2d9   : > { %v1427_v46 = vpop.f32.mrb[0].mxu1 }
 0x2da   : > { %v1429_v58 = vpop.f32.mrb[1].mxu1 }
 0x2db   : > { %v3045_v41 = vpop.f32.mrb[0].mxu0 }
 0x2dc   : > { %v3199_v48 = vadd.f32 %v3045_v41, %v1427_v46  ;;  %v3047_v60 = vpop.f32.mrb[1].mxu0 }
 0x2dd   : > { %v3200_v17 = vadd.f32 %v3047_v60, %v1429_v58 }
 0x2de   : > { %3052 = vst [vmem:[%s177_s23] sm:$0xff] %v3199_v48  ;;  %v3057_v56 = vmul.f32 %v3199_v48, %v3199_v48 }
 0x2df   : > { %3053 = vst [vmem:[%s177_s23 + $0x8] sm:$0xff] %v3200_v17  ;;  %v3058_v27 = vmul.f32 %v3200_v17, %v3200_v17  ;;  %v3054_v6 = vadd.f32 %v3200_v17, %v3199_v48 }
 0x2e1   : > { %3055 = vadd.xlane.f32.xlu0 %v3054_v6  ;;  %v3059_v10 = vadd.f32 %v3058_v27, %v3057_v56 }
 0x2e3   : > { %3060 = vadd.xlane.f32.xlu1 %v3059_v10 }
 0x36e   : > { %v3056_v28 = vpop.xlane.xlu0 %3055 }
 0x370   : > { %v3061_v7 = vpop.xlane.xlu1 %3060 }
 0x371   : > { %v3063_v21 = vsel %vm3062_vm9, %v3056_v28, %v3061_v7 }
 0x372   : > { %3065 = vst.msk [vmem:[%s181_s27] sm:$0xff] %vm3064_vm10, %v3063_v21 }
 0x373 PF: > { %s14_s12 = sadd.s32 1, %s3270_s12  }
 0x374   : > { %p11_p4 = scmp.ge.s32.totalorder %s14_s12, 4  }
 0x376   :  { %13 = sbr.rel (!%p11_p4) target bundleno = 1 (0x1), region = 78 }

</bundles_post_ra>
